<compile_context>
chip_gen: v6e
topology: v6e:2x2x1
jax: 0.10.0
libtpu: 0.0.40
codegen_flags: <defaults>
</compile_context>

<pallas_src>
import functools

import jax
import jax.numpy as jnp
from jax import lax
from jax.experimental import pallas as pl
from jax.experimental.pallas import tpu as pltpu


def _dilconv_kernel(x_ref, wdw_ref, wpw_ref, z_ref, stats_ref, *,
                    KH, KW, stride, dilation, Ho_blk, Wo, C_in, Ho, needs_mask):
    # x_ref:     (1, Hp_pad, Wp, C_in) zero-padded NHWC image (f32, resident per n)
    # wdw_ref:   (KH*KW, 1, 1, C_in)   depthwise taps (f32)
    # wpw_ref:   (C_in, Cp)            pointwise 1x1 weights (bf16, lane-dense Cp)
    # z_ref:     (1, 1, M, Cp)         conv output tile (bf16), M = Ho_blk*Wo
    # stats_ref: (1, 1, 2, Cp)         per-tile [sum, sum-of-squares] (f32)
    hb = pl.program_id(1)
    Hi_blk = (Ho_blk - 1) * stride + (KH - 1) * dilation + 1
    M = Ho_blk * Wo

    # Input-row halo window for this output-row block; ReLU once (pad zeros stay 0).
    row_step = Ho_blk * stride
    row0 = hb * row_step
    if row_step % 8 == 0:
        row0 = pl.multiple_of(row0, 8)
    xw = x_ref[0, pl.ds(row0, Hi_blk), :, :]            # (Hi_blk, Wp, C_in)
    xw = jnp.maximum(xw, 0.0)

    # Depthwise dilated conv: KH*KW shifted VPU FMAs, f32 accumulator.
    acc = jnp.zeros((Ho_blk, Wo, C_in), jnp.float32)
    for kh in range(KH):
        for kw in range(KW):
            h0 = kh * dilation
            w0 = kw * dilation
            patch = xw[h0:h0 + (Ho_blk - 1) * stride + 1:stride,
                       w0:w0 + (Wo - 1) * stride + 1:stride, :]   # (Ho_blk, Wo, C_in)
            acc = acc + patch * wdw_ref[kh * KW + kw]             # (1,1,C_in) bcast

    # Pointwise 1x1 conv: one MXU matmul, bf16 operands, f32 accumulator.
    lhs = acc.reshape(M, C_in).astype(wpw_ref.dtype)
    z = jnp.dot(lhs, wpw_ref[...], preferred_element_type=jnp.float32)  # (M, Cp) f32

    # BatchNorm partial stats in f32 from the vreg-resident result; mask the
    # padded tail rows of the last row-block so they don't pollute the stats.
    if needs_mask:
        n_valid = jnp.minimum(Ho - hb * Ho_blk, Ho_blk) * Wo
        zs = jnp.where(lax.broadcasted_iota(jnp.int32, (M, 1), 0) < n_valid, z, 0.0)
    else:
        zs = z
    stats_ref[0, 0, 0:1, :] = jnp.sum(zs, axis=0, keepdims=True)
    stats_ref[0, 0, 1:2, :] = jnp.sum(zs * zs, axis=0, keepdims=True)

    # Lane-dense bf16 store of the conv output (halves the post-conv HBM bytes).
    z_ref[0, 0] = z.astype(z_ref.dtype)


def dilconv_forward(x_nchw, w_dw, w_pw, gamma, beta, *,
                    kernel_size, stride, padding, dilation, eps=1e-5,
                    matmul_dtype=jnp.bfloat16, target_rows=256):
    """x_nchw: (N, C_in, H, W). Returns (N, C_out, Ho, Wo), matching PyTorch."""
    N, C_in, H, W = x_nchw.shape
    C_out = w_pw.shape[0]
    KH = KW = kernel_size
    eff = dilation * (kernel_size - 1) + 1
    Ho = (H + 2 * padding - eff) // stride + 1
    Wo = (W + 2 * padding - eff) // stride + 1
    Hp, Wp = H + 2 * padding, W + 2 * padding
    Cp = ((C_out + 127) // 128) * 128                   # lane-dense channels

    # Output-row block: aim for M = Ho_blk*Wo ~ target_rows MXU rows; cdiv grid
    # with an in-kernel masked tail (no divisibility requirement -> no M=Wo cliff).
    Ho_blk = max(1, min(Ho, target_rows // max(Wo, 1)))
    HB = pl.cdiv(Ho, Ho_blk)
    M = Ho_blk * Wo
    needs_mask = (Ho % Ho_blk) != 0

    # Bottom-pad so the last row-block's halo window stays in bounds.
    Hp_need = (HB * Ho_blk - 1) * stride + (KH - 1) * dilation + 1
    pad_bot = padding + max(0, Hp_need - Hp)
    Hp_pad = H + padding + pad_bot

    # ---- wrapper-side glue (layout, padding, weight prep) --------------------
    x_nhwc = jnp.transpose(x_nchw, (0, 2, 3, 1)).astype(jnp.float32)
    x_pad = jnp.pad(x_nhwc,
                    ((0, 0), (padding, pad_bot), (padding, padding), (0, 0)))
    wdw_taps = jnp.transpose(w_dw[:, 0, :, :], (1, 2, 0)) \
                  .reshape(KH * KW, 1, 1, C_in).astype(jnp.float32)
    wpw_t = jnp.pad(jnp.transpose(w_pw[:, :, 0, 0], (1, 0)),
                    ((0, 0), (0, Cp - C_out))).astype(matmul_dtype)

    # VMEM budget: generous on v5e/v6e (128 MiB physical), safe elsewhere.
    try:
        vmem_cap = int(pltpu.get_tpu_info().vmem_capacity_bytes)
        vmem_limit = max(32 * 1024 * 1024,
                         min((vmem_cap * 3) // 4, 100 * 1024 * 1024))
    except Exception:
        vmem_limit = 32 * 1024 * 1024
    cparams = pltpu.CompilerParams(
        dimension_semantics=("parallel", "parallel"),
        vmem_limit_bytes=vmem_limit)

    kernel = functools.partial(
        _dilconv_kernel, KH=KH, KW=KW, stride=stride, dilation=dilation,
        Ho_blk=Ho_blk, Wo=Wo, C_in=C_in, Ho=Ho, needs_mask=needs_mask)

    z, stats = pl.pallas_call(
        kernel,
        out_shape=(jax.ShapeDtypeStruct((N, HB, M, Cp), jnp.bfloat16),
                   jax.ShapeDtypeStruct((N, HB, 2, Cp), jnp.float32)),
        grid=(N, HB),
        in_specs=[
            pl.BlockSpec((1, Hp_pad, Wp, C_in), lambda n, hb: (n, 0, 0, 0)),
            pl.BlockSpec((KH * KW, 1, 1, C_in), lambda n, hb: (0, 0, 0, 0)),
            pl.BlockSpec((C_in, Cp), lambda n, hb: (0, 0)),
        ],
        out_specs=(
            pl.BlockSpec((1, 1, M, Cp), lambda n, hb: (n, hb, 0, 0)),
            pl.BlockSpec((1, 1, 2, Cp), lambda n, hb: (n, hb, 0, 0)),
        ),
        compiler_params=cparams,
    )(x_pad, wdw_taps, wpw_t)

    # ---- tiny stats reduction + fold BN into one scale/bias (plain JAX) ------
    # Applied together with the unpad + NCHW transpose so XLA fuses the FMA
    # into the layout copy (no second Pallas pass, no extra HBM round trip).
    count = float(N * Ho * Wo)
    total = jnp.sum(stats, axis=(0, 1))                 # (2, Cp)
    mean = total[0] / count
    var = jnp.maximum(total[1] / count - mean * mean, 0.0)   # biased variance
    gamma_p = jnp.pad(gamma.astype(jnp.float32), (0, Cp - C_out),
                      constant_values=1.0)
    beta_p = jnp.pad(beta.astype(jnp.float32), (0, Cp - C_out))
    scale = gamma_p * lax.rsqrt(var + eps)
    bias = beta_p - mean * scale

    y = z.astype(jnp.float32) * scale + bias            # (N, HB, M, Cp)
    y = y.reshape(N, HB * Ho_blk, Wo, Cp)[:, :Ho, :, :C_out]
    return jnp.transpose(y, (0, 3, 1, 2))               # back to NCHW


def _reference(x_nchw, w_dw, w_pw, gamma, beta, *,
               kernel_size, stride, padding, dilation, eps=1e-5):
    """Pure-JAX reference mirroring the PyTorch module (train-mode BN)."""
    C_in = x_nchw.shape[1]
    x = jnp.maximum(x_nchw, 0.0)
    dn = ('NCHW', 'OIHW', 'NCHW')
    y = lax.conv_general_dilated(
        x, w_dw, window_strides=(stride, stride),
        padding=[(padding, padding), (padding, padding)],
        rhs_dilation=(dilation, dilation),
        dimension_numbers=dn, feature_group_count=C_in,
        precision=lax.Precision.HIGHEST)
    y = lax.conv_general_dilated(
        y, w_pw, window_strides=(1, 1), padding=[(0, 0), (0, 0)],
        dimension_numbers=dn, precision=lax.Precision.HIGHEST)
    mean = jnp.mean(y, axis=(0, 2, 3), keepdims=True)
    var = jnp.mean((y - mean) ** 2, axis=(0, 2, 3), keepdims=True)
    yn = (y - mean) * lax.rsqrt(var + eps)
    return yn * gamma[None, :, None, None] + beta[None, :, None, None]


if __name__ == "__main__":
    # DARTS dil_conv_3x3 hyperparameters at a small size.
    N, C_in, C_out, H, W = 2, 4, 8, 16, 16
    kernel_size, stride, padding, dilation = 3, 1, 2, 2

    key = jax.random.PRNGKey(0)
    k1, k2, k3 = jax.random.split(key, 3)
    x = jax.random.normal(k1, (N, C_in, H, W), dtype=jnp.float32)
    w_dw = jax.random.normal(k2, (C_in, 1, kernel_size, kernel_size),
                             dtype=jnp.float32) * 0.2
    w_pw = jax.random.normal(k3, (C_out, C_in, 1, 1), dtype=jnp.float32) * 0.2
    gamma = jnp.ones((C_out,), dtype=jnp.float32)   # BN affine weight init
    beta = jnp.zeros((C_out,), dtype=jnp.float32)   # BN affine bias init

    out = dilconv_forward(x, w_dw, w_pw, gamma, beta,
                          kernel_size=kernel_size, stride=stride,
                          padding=padding, dilation=dilation)
    out = jax.block_until_ready(out)

    ref = _reference(x, w_dw, w_pw, gamma, beta,
                     kernel_size=kernel_size, stride=stride,
                     padding=padding, dilation=dilation)
    assert out.shape == (N, C_out, H, W), out.shape
    # bf16 MXU operands + bf16 z intermediate -> loosened tolerance (review note).
    assert jnp.allclose(out, ref, atol=3e-2, rtol=3e-2), \
        float(jnp.max(jnp.abs(out - ref)))

    print("KERNEL_OK")
</pallas_src>

<mosaic_0001>
module attributes {stable_mosaic.version = 11 : i64} {
  func.func @_dilconv_kernel(%arg0: i32, %arg1: i32, %arg2: memref<1x20x20x4xf32, #tpu.memory_space<vmem>>, %arg3: memref<9x1x1x4xf32, #tpu.memory_space<vmem>>, %arg4: memref<4x128xbf16, #tpu.memory_space<vmem>>, %arg5: memref<1x1x256x128xbf16, #tpu.memory_space<vmem>>, %arg6: memref<1x1x2x128xf32, #tpu.memory_space<vmem>>) attributes {dimension_semantics = [#tpu.dimension_semantics<parallel>, #tpu.dimension_semantics<parallel>], iteration_bounds = array<i64: 2, 1>, scalar_prefetch = 0 : i64, scratch_operands = 0 : i64, tpu.core_type = #tpu.core_type<tc>, window_params = [{transform_indices = @transform_0, window_bounds = array<i64: 1, 20, 20, 4>}, {pipeline_mode = #tpu.pipeline_mode<synchronous>, transform_indices = @transform_1, window_bounds = array<i64: 9, 1, 1, 4>}, {pipeline_mode = #tpu.pipeline_mode<synchronous>, transform_indices = @transform_2, window_bounds = array<i64: 4, 128>}, {transform_indices = @transform_3, window_bounds = array<i64: 1, 1, 256, 128>}, {transform_indices = @transform_4, window_bounds = array<i64: 1, 1, 2, 128>}]} {
    %c16_i32 = arith.constant 16 : i32
    %0 = arith.muli %arg1, %c16_i32 : i32
    %1 = tpu.assume_multiple %0, 8 : i32
    %c0 = arith.constant 0 : index
    %2 = arith.index_cast %1 : i32 to index
    %c0_0 = arith.constant 0 : index
    %c0_1 = arith.constant 0 : index
    %3 = vector.load %arg2[%c0, %2, %c0_0, %c0_1] : memref<1x20x20x4xf32, #tpu.memory_space<vmem>>, vector<1x20x20x4xf32>
    %4 = vector.shape_cast %3 : vector<1x20x20x4xf32> to vector<20x20x4xf32>
    %cst = arith.constant 0.000000e+00 : f32
    %5 = vector.broadcast %cst : f32 to vector<20x20x4xf32>
    %6 = arith.maximumf %4, %5 : vector<20x20x4xf32>
    %cst_2 = arith.constant 0.000000e+00 : f32
    %7 = vector.broadcast %cst_2 : f32 to vector<16x16x4xf32>
    %8 = vector.extract_strided_slice %6 {offsets = [0, 0, 0], sizes = [16, 16, 4], strides = [1, 1, 1]} : vector<20x20x4xf32> to vector<16x16x4xf32>
    %c0_3 = arith.constant 0 : index
    %c0_4 = arith.constant 0 : index
    %c0_5 = arith.constant 0 : index
    %c0_6 = arith.constant 0 : index
    %9 = vector.load %arg3[%c0_3, %c0_4, %c0_5, %c0_6] : memref<9x1x1x4xf32, #tpu.memory_space<vmem>>, vector<1x1x1x4xf32>
    %10 = vector.shape_cast %9 : vector<1x1x1x4xf32> to vector<1x1x4xf32>
    %11 = vector.broadcast %10 : vector<1x1x4xf32> to vector<16x16x4xf32>
    %12 = arith.mulf %8, %11 : vector<16x16x4xf32>
    %13 = arith.addf %7, %12 : vector<16x16x4xf32>
    %14 = vector.extract_strided_slice %6 {offsets = [0, 2, 0], sizes = [16, 16, 4], strides = [1, 1, 1]} : vector<20x20x4xf32> to vector<16x16x4xf32>
    %c1 = arith.constant 1 : index
    %c0_7 = arith.constant 0 : index
    %c0_8 = arith.constant 0 : index
    %c0_9 = arith.constant 0 : index
    %15 = vector.load %arg3[%c1, %c0_7, %c0_8, %c0_9] : memref<9x1x1x4xf32, #tpu.memory_space<vmem>>, vector<1x1x1x4xf32>
    %16 = vector.shape_cast %15 : vector<1x1x1x4xf32> to vector<1x1x4xf32>
    %17 = vector.broadcast %16 : vector<1x1x4xf32> to vector<16x16x4xf32>
    %18 = arith.mulf %14, %17 : vector<16x16x4xf32>
    %19 = arith.addf %13, %18 : vector<16x16x4xf32>
    %20 = vector.extract_strided_slice %6 {offsets = [0, 4, 0], sizes = [16, 16, 4], strides = [1, 1, 1]} : vector<20x20x4xf32> to vector<16x16x4xf32>
    %c2 = arith.constant 2 : index
    %c0_10 = arith.constant 0 : index
    %c0_11 = arith.constant 0 : index
    %c0_12 = arith.constant 0 : index
    %21 = vector.load %arg3[%c2, %c0_10, %c0_11, %c0_12] : memref<9x1x1x4xf32, #tpu.memory_space<vmem>>, vector<1x1x1x4xf32>
    %22 = vector.shape_cast %21 : vector<1x1x1x4xf32> to vector<1x1x4xf32>
    %23 = vector.broadcast %22 : vector<1x1x4xf32> to vector<16x16x4xf32>
    %24 = arith.mulf %20, %23 : vector<16x16x4xf32>
    %25 = arith.addf %19, %24 : vector<16x16x4xf32>
    %26 = vector.extract_strided_slice %6 {offsets = [2, 0, 0], sizes = [16, 16, 4], strides = [1, 1, 1]} : vector<20x20x4xf32> to vector<16x16x4xf32>
    %c3 = arith.constant 3 : index
    %c0_13 = arith.constant 0 : index
    %c0_14 = arith.constant 0 : index
    %c0_15 = arith.constant 0 : index
    %27 = vector.load %arg3[%c3, %c0_13, %c0_14, %c0_15] : memref<9x1x1x4xf32, #tpu.memory_space<vmem>>, vector<1x1x1x4xf32>
    %28 = vector.shape_cast %27 : vector<1x1x1x4xf32> to vector<1x1x4xf32>
    %29 = vector.broadcast %28 : vector<1x1x4xf32> to vector<16x16x4xf32>
    %30 = arith.mulf %26, %29 : vector<16x16x4xf32>
    %31 = arith.addf %25, %30 : vector<16x16x4xf32>
    %32 = vector.extract_strided_slice %6 {offsets = [2, 2, 0], sizes = [16, 16, 4], strides = [1, 1, 1]} : vector<20x20x4xf32> to vector<16x16x4xf32>
    %c4 = arith.constant 4 : index
    %c0_16 = arith.constant 0 : index
    %c0_17 = arith.constant 0 : index
    %c0_18 = arith.constant 0 : index
    %33 = vector.load %arg3[%c4, %c0_16, %c0_17, %c0_18] : memref<9x1x1x4xf32, #tpu.memory_space<vmem>>, vector<1x1x1x4xf32>
    %34 = vector.shape_cast %33 : vector<1x1x1x4xf32> to vector<1x1x4xf32>
    %35 = vector.broadcast %34 : vector<1x1x4xf32> to vector<16x16x4xf32>
    %36 = arith.mulf %32, %35 : vector<16x16x4xf32>
    %37 = arith.addf %31, %36 : vector<16x16x4xf32>
    %38 = vector.extract_strided_slice %6 {offsets = [2, 4, 0], sizes = [16, 16, 4], strides = [1, 1, 1]} : vector<20x20x4xf32> to vector<16x16x4xf32>
    %c5 = arith.constant 5 : index
    %c0_19 = arith.constant 0 : index
    %c0_20 = arith.constant 0 : index
    %c0_21 = arith.constant 0 : index
    %39 = vector.load %arg3[%c5, %c0_19, %c0_20, %c0_21] : memref<9x1x1x4xf32, #tpu.memory_space<vmem>>, vector<1x1x1x4xf32>
    %40 = vector.shape_cast %39 : vector<1x1x1x4xf32> to vector<1x1x4xf32>
    %41 = vector.broadcast %40 : vector<1x1x4xf32> to vector<16x16x4xf32>
    %42 = arith.mulf %38, %41 : vector<16x16x4xf32>
    %43 = arith.addf %37, %42 : vector<16x16x4xf32>
    %44 = vector.extract_strided_slice %6 {offsets = [4, 0, 0], sizes = [16, 16, 4], strides = [1, 1, 1]} : vector<20x20x4xf32> to vector<16x16x4xf32>
    %c6 = arith.constant 6 : index
    %c0_22 = arith.constant 0 : index
    %c0_23 = arith.constant 0 : index
    %c0_24 = arith.constant 0 : index
    %45 = vector.load %arg3[%c6, %c0_22, %c0_23, %c0_24] : memref<9x1x1x4xf32, #tpu.memory_space<vmem>>, vector<1x1x1x4xf32>
    %46 = vector.shape_cast %45 : vector<1x1x1x4xf32> to vector<1x1x4xf32>
    %47 = vector.broadcast %46 : vector<1x1x4xf32> to vector<16x16x4xf32>
    %48 = arith.mulf %44, %47 : vector<16x16x4xf32>
    %49 = arith.addf %43, %48 : vector<16x16x4xf32>
    %50 = vector.extract_strided_slice %6 {offsets = [4, 2, 0], sizes = [16, 16, 4], strides = [1, 1, 1]} : vector<20x20x4xf32> to vector<16x16x4xf32>
    %c7 = arith.constant 7 : index
    %c0_25 = arith.constant 0 : index
    %c0_26 = arith.constant 0 : index
    %c0_27 = arith.constant 0 : index
    %51 = vector.load %arg3[%c7, %c0_25, %c0_26, %c0_27] : memref<9x1x1x4xf32, #tpu.memory_space<vmem>>, vector<1x1x1x4xf32>
    %52 = vector.shape_cast %51 : vector<1x1x1x4xf32> to vector<1x1x4xf32>
    %53 = vector.broadcast %52 : vector<1x1x4xf32> to vector<16x16x4xf32>
    %54 = arith.mulf %50, %53 : vector<16x16x4xf32>
    %55 = arith.addf %49, %54 : vector<16x16x4xf32>
    %56 = vector.extract_strided_slice %6 {offsets = [4, 4, 0], sizes = [16, 16, 4], strides = [1, 1, 1]} : vector<20x20x4xf32> to vector<16x16x4xf32>
    %c8 = arith.constant 8 : index
    %c0_28 = arith.constant 0 : index
    %c0_29 = arith.constant 0 : index
    %c0_30 = arith.constant 0 : index
    %57 = vector.load %arg3[%c8, %c0_28, %c0_29, %c0_30] : memref<9x1x1x4xf32, #tpu.memory_space<vmem>>, vector<1x1x1x4xf32>
    %58 = vector.shape_cast %57 : vector<1x1x1x4xf32> to vector<1x1x4xf32>
    %59 = vector.broadcast %58 : vector<1x1x4xf32> to vector<16x16x4xf32>
    %60 = arith.mulf %56, %59 : vector<16x16x4xf32>
    %61 = arith.addf %55, %60 : vector<16x16x4xf32>
    %62 = vector.shape_cast %61 : vector<16x16x4xf32> to vector<256x4xf32>
    %63 = arith.truncf %62 : vector<256x4xf32> to vector<256x4xbf16>
    %c0_31 = arith.constant 0 : index
    %c0_32 = arith.constant 0 : index
    %64 = vector.load %arg4[%c0_31, %c0_32] : memref<4x128xbf16, #tpu.memory_space<vmem>>, vector<4x128xbf16>
    %cst_33 = arith.constant dense<0.000000e+00> : vector<256x128xf32>
    %65 = tpu.matmul %63, %64, %cst_33 {dimension_numbers = #tpu.dot_dimension_numbers<[1], [0], [0], [1], [0, 0, 1, 1], [], []>} : vector<256x4xbf16>, vector<4x128xbf16>, vector<256x128xf32> -> vector<256x128xf32>
    %cst_34 = arith.constant dense<0.000000e+00> : vector<128xf32>
    %66 = vector.multi_reduction <add>, %65, %cst_34 [0] : vector<256x128xf32> to vector<128xf32>
    %67 = vector.shape_cast %66 : vector<128xf32> to vector<1x128xf32>
    %c0_35 = arith.constant 0 : index
    %c0_36 = arith.constant 0 : index
    %c0_37 = arith.constant 0 : index
    %c0_38 = arith.constant 0 : index
    %68 = vector.load %arg6[%c0_35, %c0_36, %c0_37, %c0_38] : memref<1x1x2x128xf32, #tpu.memory_space<vmem>>, vector<1x1x1x128xf32>
    %69 = vector.shape_cast %68 : vector<1x1x1x128xf32> to vector<1x128xf32>
    %70 = vector.shape_cast %67 : vector<1x128xf32> to vector<1x1x1x128xf32>
    tpu.vector_store %arg6[%c0_35, %c0_36, %c0_37, %c0_38], %70 {strides = array<i32>} : memref<1x1x2x128xf32, #tpu.memory_space<vmem>>, vector<1x1x1x128xf32>,
    %71 = arith.mulf %65, %65 : vector<256x128xf32>
    %cst_39 = arith.constant dense<0.000000e+00> : vector<128xf32>
    %72 = vector.multi_reduction <add>, %71, %cst_39 [0] : vector<256x128xf32> to vector<128xf32>
    %73 = vector.shape_cast %72 : vector<128xf32> to vector<1x128xf32>
    %c0_40 = arith.constant 0 : index
    %c0_41 = arith.constant 0 : index
    %c1_42 = arith.constant 1 : index
    %c0_43 = arith.constant 0 : index
    %74 = vector.load %arg6[%c0_40, %c0_41, %c1_42, %c0_43] : memref<1x1x2x128xf32, #tpu.memory_space<vmem>>, vector<1x1x1x128xf32>
    %75 = vector.shape_cast %74 : vector<1x1x1x128xf32> to vector<1x128xf32>
    %76 = vector.shape_cast %73 : vector<1x128xf32> to vector<1x1x1x128xf32>
    tpu.vector_store %arg6[%c0_40, %c0_41, %c1_42, %c0_43], %76 {strides = array<i32>} : memref<1x1x2x128xf32, #tpu.memory_space<vmem>>, vector<1x1x1x128xf32>,
    %77 = arith.truncf %65 : vector<256x128xf32> to vector<256x128xbf16>
    %c0_44 = arith.constant 0 : index
    %c0_45 = arith.constant 0 : index
    %c0_46 = arith.constant 0 : index
    %c0_47 = arith.constant 0 : index
    %78 = vector.load %arg5[%c0_44, %c0_45, %c0_46, %c0_47] : memref<1x1x256x128xbf16, #tpu.memory_space<vmem>>, vector<1x1x256x128xbf16>
    %79 = vector.shape_cast %78 : vector<1x1x256x128xbf16> to vector<256x128xbf16>
    %80 = vector.shape_cast %77 : vector<256x128xbf16> to vector<1x1x256x128xbf16>
    tpu.vector_store %arg5[%c0_44, %c0_45, %c0_46, %c0_47], %80 {strides = array<i32>} : memref<1x1x256x128xbf16, #tpu.memory_space<vmem>>, vector<1x1x256x128xbf16>,
    return
  }
  func.func @transform_0(%arg0: i32, %arg1: i32) -> (i32, i32, i32, i32) {
    %c0_i32 = arith.constant 0 : i32
    %c0_i32_0 = arith.constant 0 : i32
    %c0_i32_1 = arith.constant 0 : i32
    %c0_i32_2 = arith.constant 0 : i32
    return %arg0, %c0_i32, %c0_i32_0, %c0_i32_1 : i32, i32, i32, i32
  }
  func.func @transform_1(%arg0: i32, %arg1: i32) -> (i32, i32, i32, i32) {
    %c0_i32 = arith.constant 0 : i32
    %c0_i32_0 = arith.constant 0 : i32
    %c0_i32_1 = arith.constant 0 : i32
    %c0_i32_2 = arith.constant 0 : i32
    %c0_i32_3 = arith.constant 0 : i32
    return %c0_i32, %c0_i32_0, %c0_i32_1, %c0_i32_2 : i32, i32, i32, i32
  }
  func.func @transform_2(%arg0: i32, %arg1: i32) -> (i32, i32) {
    %c0_i32 = arith.constant 0 : i32
    %c0_i32_0 = arith.constant 0 : i32
    %c0_i32_1 = arith.constant 0 : i32
    return %c0_i32, %c0_i32_0 : i32, i32
  }
  func.func @transform_3(%arg0: i32, %arg1: i32) -> (i32, i32, i32, i32) {
    %c0_i32 = arith.constant 0 : i32
    %c0_i32_0 = arith.constant 0 : i32
    %c0_i32_1 = arith.constant 0 : i32
    return %arg0, %arg1, %c0_i32, %c0_i32_0 : i32, i32, i32, i32
  }
  func.func @transform_4(%arg0: i32, %arg1: i32) -> (i32, i32, i32, i32) {
    %c0_i32 = arith.constant 0 : i32
    %c0_i32_0 = arith.constant 0 : i32
    %c0_i32_1 = arith.constant 0 : i32
    return %arg0, %arg1, %c0_i32, %c0_i32_0 : i32, i32, i32, i32
  }
}

</mosaic_0001>

<bundles_post_ra>
// kernel: tpu_custom_call.1
= control target key start
LH: loop header
LB: loop body
LE: loop exit
PB: predicated region body
PF: predicated region fallthrough
CT: control target
= control target key end

     0   :  { %10 = vsyncpa [#allocation3], 0  ;;  %s4633_s0 = inlined_call_operand.vmem [shape: f32[2,20,20,4], index: 0, kind: input, shape index: {}]   ;;  %s4634_s1 = inlined_call_operand.vmem [shape: f32[9,1,1,4], index: 1, kind: input, shape index: {}]   ;;  %s4635_s2 = inlined_call_operand.vmem [shape: bf16[4,128], index: 2, kind: input, shape index: {}]   ;;  %s4636_s3 = inlined_call_operand.hbm [shape: bf16[2,1,256,128], index: 3, kind: output, shape index: {0}]   ;;  %s4637_s4 = inlined_call_operand.hbm [shape: f32[2,1,2,128], index: 4, kind: output, shape index: {1}]  }
   0x1   :  { %12 = vsyncpa [#allocation3 + $0x1], 0 }
   0x2   :  { %13 = vsyncpa [#allocation5], 0 }
   0x3   :  { %15 = vsyncpa [#allocation5 + $0x1], 0  ;;  %s3175_s15 = smov 0   ;;  %s3177_s16 = smov 0  }
   0x4   :  { %s3179_s17 = smov 0   ;;  %s3181_s18 = smov 0  }
   0x5   :  { %s3183_s19 = smov 0   ;;  %s3185_s20 = smov 0  }
   0x6 LB: > { %s2694_s21 = sadd.s32 4294967295, %s3144_s20   ;;  %s2695_s22 = sadd.s32 4294967294, %s3144_s20   ;;  %s3144_s20 = sphi %s3185_s20, %s21_s20   ;;  %s3140_s19 = sphi %s3183_s19, %s4644_s19   ;;  %s3136_s18 = sphi %s3181_s18, %s4643_s18   ;;  %s3132_s17 = sphi %s3179_s17, %s4642_s17   ;;  %s3128_s16 = sphi %s3177_s16, %s4641_s16   ;;  %s3124_s15 = sphi %s3175_s15, %s4640_s15  }
   0x7   : > { %s33_s23 = sadd.s32 1, %s3140_s19  ;;  %s110_s24 = sadd.s32 1, %s3132_s17 }
   0x8   : > { %p35_p0 = scmp.ge.s32.totalorder %s33_s23, 2  ;;  %p120_p1 = scmp.ne.s32.totalorder %s3132_s17, %s3128_s16 }
   0x9   : > { %p121_p2 = scmp.eq.s32.totalorder %s2694_s21, 1  ;;  %p126_p3 = scmp.ne.s32.totalorder %s3128_s16, %s3124_s15 }
   0xa   : > { %s4646_s23 = smov (%p35_p0, %s33_s23), 0  ;;  %p127_p5 = scmp.eq.s32.totalorder %s2695_s22, 1 }
   0xb   : > { %p3215_p4 = por %p121_p2, %p120_p1  ;;  %s105_s26 = ssub.s32 %s3140_s19, %s4646_s23 }
   0xc   : > { %p2698_p6 = scmp.ge.s32.totalorder %s3144_s20, 1  ;;  %p108_p7 = scmp.eq.s32.totalorder %s105_s26, 0 }
   0xd   : > { %p3222_p8 = por %p127_p5, %p126_p3  ;;  %p187_p9 = scmp.lt.s32.totalorder %s3144_s20, 3 }
   0xe   : > { %s3228_s28 = scalar_select %p108_p7, %s3132_s17, %s110_s24  }
   0xf   : > { %p188_p10 = pnand %p2698_p6, %p187_p9 }
  0x10   : > { %p218_p11 = scmp.lt.s32.totalorder (!%p188_p10), %s3136_s18, 1  ;;  %s3146_s13 = smov (!%p188_p10), [#allocation2]  }
  0x11   : > { %191 = sbr.rel (%p188_p10) target bundleno = 575 (0x23f), region = 32  ;;  %s3042_s14 = sshll.u32 (!%p188_p10), %s3146_s13, 4  ;;  %s3043_s14 = int_to_ptr.vmem [resolvable:$false] %s3042_s14 }
  0x12   : > { %s3044_s21 = scalar_lea.vmem (!%p188_p10), %s3043_s14, 4096 }
  0x16   : > { %v2068_v0 = vld [vmem:[%s4635_s2] sm:$0x3]  ;;  %vm2118_vm0 = vcmask 1041408   ;;  %s219_s5 = scalar_select %p218_p11, %s3136_s18, 1  ;;  %vm522_vm1 = vcmask 1045504   ;;  %vm771_vm2 = vcmask 1043456  }
  0x17   : > { %2955 = vmatprep.subr.msk.bf16.mxu0 %vm2118_vm0, %v2068_v0  ;;  %v2120_v1 = vsel %vm2118_vm0, %v2068_v0, 0  ;;  %2956 = vmatprep.subr.msk.bf16.mxu1 %vm2118_vm0, %v2068_v0  ;;  %v3243_v2 = vld [vmem:[%s4634_s1] ss:$0 sm:$0xff]  ;;  %v3248_v3 = vld [vmem:[%s4634_s1 + $0x1] ss:$0 sm:$0xff]  ;;  %vm2069_vm3 = vcmask 31744  }
  0x18   : > { %2920 = vmatpush3.bf16.msra.mxu0 %v2120_v1  ;;  %2954 = vmatpush3.bf16.msra.mxu1 %v2120_v1  ;;  %s2957_s6 = smul.u32 480, %s219_s5  ;;  %v3256_v7 = vld [vmem:[%s4634_s1 + $0x2] ss:$0 sm:$0xff]  ;;  %v3277_v22 = vld [vmem:[%s4634_s1 + $0x3] ss:$0 sm:$0xff]  ;;  %s2806_s5 = sshll.u32 %s3136_s18, 11 }
  0x19   : > { %v3291_v31 = vld [vmem:[%s4634_s1 + $0x4] ss:$0 sm:$0xff]  ;;  %v3301_v36 = vld [vmem:[%s4634_s1 + $0x5] ss:$0 sm:$0xff]  ;;  %v3317_v49 = vld [vmem:[%s4634_s1 + $0x6] ss:$0 sm:$0xff]  ;;  %s4564_s10 = scalar_lea.hbm %s4636_s3, %s2806_s5 }
  0x1a   : > { %s3238_s9 = scalar_lea.vmem %s4633_s0, %s2957_s6  ;;  %v3327_v58 = vld [vmem:[%s4634_s1 + $0x7] ss:$0 sm:$0xff] }
  0x1b   : > { %v227_v4 = vld [vmem:[%s3238_s9] sm:$0xff]  ;;  %v228_v5 = vld [vmem:[%s3238_s9 + $0x8] sm:$0xff]  ;;  %v229_v6 = vld [vmem:[%s3238_s9 + $0x10] sm:$0xf] }
  0x1c   : > { %v233_v8 = vld [vmem:[%s3238_s9 + $0x30] sm:$0xff]  ;;  %v234_v9 = vld [vmem:[%s3238_s9 + $0x38] sm:$0xff]  ;;  %v235_v10 = vld [vmem:[%s3238_s9 + $0x40] sm:$0xf]  ;;  %v287_v11 = vmax.f32 %v227_v4, 0.0  ;;  %v288_v12 = vmax.f32 %v228_v5, 0.0 }
  0x1d   : > { %v239_v13 = vld [vmem:[%s3238_s9 + $0x60] sm:$0xff]  ;;  %v240_v14 = vld [vmem:[%s3238_s9 + $0x68] sm:$0xff]  ;;  %v241_v15 = vld [vmem:[%s3238_s9 + $0x70] sm:$0xf]  ;;  %v289_v16 = vmax.f32 %v229_v6, 0.0  ;;  %v3264_v17 = vmax.f32 %v233_v8, 0.0 }
  0x1e   : > { %v3266_v18 = vmax.f32 %v234_v9, 0.0  ;;  %v3268_v19 = vmax.f32 %v235_v10, 0.0  ;;  %v3270_v20 = vmax.f32 %v239_v13, 0.0  ;;  %v3272_v21 = vmax.f32 %v240_v14, 0.0  ;;  %v3336_v5 = vld [vmem:[%s4634_s1 + $0x8] ss:$0 sm:$0xff] }
  0x1f   : > { %v3279_v23 = vmax.f32 %v241_v15, 0.0  ;;  %v354_v24 = vmul.f32 %v3243_v2, %v287_v11  ;;  %v355_v25 = vmul.f32 %v3243_v2, %v288_v12  ;;  %v426_v26 = vmul.f32 %v3248_v3, %v287_v11  ;;  %v230_v15 = vld [vmem:[%s3238_s9 + $0x18] sm:$0xff] }
  0x20   : > { %v427_v27 = vmul.f32 %v3248_v3, %v288_v12  ;;  %v428_v28 = vmul.f32 %v3248_v3, %v289_v16  ;;  %v675_v29 = vmul.f32 %v3256_v7, %v287_v11  ;;  %v676_v30 = vmul.f32 %v3256_v7, %v288_v12 }
  0x21   : > { %v523_v32 = vrot.slane %v426_v26, 2  ;;  %v677_v33 = vmul.f32 %v3256_v7, %v289_v16  ;;  %v924_v34 = vmul.f32 %v3277_v22, %v3264_v17  ;;  %v925_v35 = vmul.f32 %v3277_v22, %v3266_v18 }
  0x22   : > { %v524_v37 = vrot.slane %v427_v27, 2  ;;  %v526_v38 = vrot.slane %v428_v28, 2  ;;  %v772_v39 = vrot.slane %v675_v29, 4  ;;  %v773_v40 = vrot.slane %v676_v30, 4 }
  0x23   : > { %v775_v41 = vrot.slane %v677_v33, 4  ;;  %v996_v42 = vmul.f32 %v3291_v31, %v3264_v17  ;;  %v997_v43 = vmul.f32 %v3291_v31, %v3266_v18  ;;  %v998_v44 = vmul.f32 %v3291_v31, %v3268_v19  ;;  %v232_v33 = vld [vmem:[%s3238_s9 + $0x28] sm:$0xf] }
  0x24   : > { %v525_v45 = vsel %vm522_vm1, %v523_v32, %v524_v37  ;;  %v527_v46 = vsel %vm522_vm1, %v524_v37, %v526_v38  ;;  %v774_v47 = vsel %vm771_vm2, %v772_v39, %v773_v40  ;;  %v1244_v48 = vmul.f32 %v3301_v36, %v3264_v17  ;;  %v231_v32 = vld [vmem:[%s3238_s9 + $0x20] sm:$0xff]  ;;  %v236_v38 = vld [vmem:[%s3238_s9 + $0x48] sm:$0xff]  ;;  %v237_v39 = vld [vmem:[%s3238_s9 + $0x50] sm:$0xff] }
  0x25   : > { %v635_v50 = vadd.f32 %v525_v45, %v354_v24  ;;  %v636_v51 = vadd.f32 %v527_v46, %v355_v25  ;;  %v776_v52 = vsel %vm771_vm2, %v773_v40, %v775_v41  ;;  %v1092_v53 = vrot.slane %v996_v42, 2  ;;  %v238_v45 = vld [vmem:[%s3238_s9 + $0x58] sm:$0xf] }
  0x26   : > { %v1093_v54 = vrot.slane %v997_v43, 2  ;;  %v1095_v55 = vrot.slane %v998_v44, 2  ;;  %v1245_v56 = vmul.f32 %v3301_v36, %v3266_v18  ;;  %v1246_v57 = vmul.f32 %v3301_v36, %v3268_v19  ;;  %v242_v46 = vld [vmem:[%s3238_s9 + $0x78] sm:$0xff] }
  0x27   : > { %v884_v59 = vadd.f32 %v774_v47, %v635_v50  ;;  %v885_v60 = vadd.f32 %v776_v52, %v636_v51  ;;  %v1340_v61 = vrot.slane %v1244_v48, 4  ;;  %v1492_v62 = vmul.f32 %v3317_v49, %v3270_v20  ;;  %v243_v50 = vld [vmem:[%s3238_s9 + $0x80] sm:$0xff]  ;;  %v244_v51 = vld [vmem:[%s3238_s9 + $0x88] sm:$0xf] }
  0x28   : > { %v1094_v63 = vsel %vm522_vm1, %v1092_v53, %v1093_v54  ;;  %v1096_v0 = vsel %vm522_vm1, %v1093_v54, %v1095_v55  ;;  %v1341_v1 = vrot.slane %v1245_v56, 4  ;;  %v1343_v4 = vrot.slane %v1246_v57, 4 }
  0x29   : > { %v956_v6 = vadd.f32 %v924_v34, %v884_v59  ;;  %v957_v8 = vadd.f32 %v925_v35, %v885_v60  ;;  %v1493_v9 = vmul.f32 %v3317_v49, %v3272_v21  ;;  %v1564_v10 = vmul.f32 %v3327_v58, %v3270_v20 }
  0x2a   : > { %v1342_v11 = vsel %vm771_vm2, %v1340_v61, %v1341_v1  ;;  %v1344_v12 = vsel %vm771_vm2, %v1341_v1, %v1343_v4  ;;  %v1565_v13 = vmul.f32 %v3327_v58, %v3272_v21  ;;  %v1566_v14 = vmul.f32 %v3327_v58, %v3279_v23 }
  0x2b   : > { %v1204_v16 = vadd.f32 %v1094_v63, %v956_v6  ;;  %v1205_v24 = vadd.f32 %v1096_v0, %v957_v8  ;;  %v1660_v25 = vrot.slane %v1564_v10, 2  ;;  %v1812_v26 = vmul.f32 %v3336_v5, %v3270_v20 }
  0x2c   : > { %v1661_v27 = vrot.slane %v1565_v13, 2  ;;  %v1663_v28 = vrot.slane %v1566_v14, 2  ;;  %v1813_v29 = vmul.f32 %v3336_v5, %v3272_v21  ;;  %v1814_v30 = vmul.f32 %v3336_v5, %v3279_v23 }
  0x2d   : > { %v1452_v34 = vadd.f32 %v1342_v11, %v1204_v16  ;;  %v1453_v35 = vadd.f32 %v1344_v12, %v1205_v24  ;;  %v1908_v37 = vrot.slane %v1812_v26, 4  ;;  %v290_v40 = vmax.f32 %v230_v15, 0.0 }
  0x2e   : > { %v1662_v41 = vsel %vm522_vm1, %v1660_v25, %v1661_v27  ;;  %v1664_v42 = vsel %vm522_vm1, %v1661_v27, %v1663_v28  ;;  %v1909_v43 = vrot.slane %v1813_v29, 4  ;;  %v1911_v44 = vrot.slane %v1814_v30, 4 }
  0x2f   : > { %v1524_v47 = vadd.f32 %v1492_v62, %v1452_v34  ;;  %v1525_v48 = vadd.f32 %v1493_v9, %v1453_v35  ;;  %v291_v52 = vmax.f32 %v231_v32, 0.0  ;;  %v292_v53 = vmax.f32 %v232_v33, 0.0 }
  0x30   : > { %v1910_v54 = vsel %vm771_vm2, %v1908_v37, %v1909_v43  ;;  %v1912_v55 = vsel %vm771_vm2, %v1909_v43, %v1911_v44  ;;  %v3367_v56 = vmax.f32 %v236_v38, 0.0  ;;  %v3369_v57 = vmax.f32 %v237_v39, 0.0 }
  0x31   : > { %v1772_v59 = vadd.f32 %v1662_v41, %v1524_v47  ;;  %v1773_v60 = vadd.f32 %v1664_v42, %v1525_v48  ;;  %v3371_v61 = vmax.f32 %v238_v45, 0.0  ;;  %v3373_v63 = vmax.f32 %v242_v46, 0.0 }
  0x32   : > { %v3375_v62 = vmax.f32 %v243_v50, 0.0  ;;  %v3377_v0 = vmax.f32 %v244_v51, 0.0  ;;  %v356_v1 = vmul.f32 %v3243_v2, %v290_v40  ;;  %v357_v4 = vmul.f32 %v3243_v2, %v291_v52 }
  0x33   : > { %v2020_v6 = vadd.f32 %v1910_v54, %v1772_v59  ;;  %v2021_v8 = vadd.f32 %v1912_v55, %v1773_v60  ;;  %v429_v9 = vmul.f32 %v3248_v3, %v290_v40  ;;  %v430_v10 = vmul.f32 %v3248_v3, %v291_v52 }
  0x34   : > { %v431_v11 = vmul.f32 %v3248_v3, %v292_v53  ;;  %v678_v12 = vmul.f32 %v3256_v7, %v290_v40  ;;  %v679_v13 = vmul.f32 %v3256_v7, %v291_v52  ;;  %v680_v14 = vmul.f32 %v3256_v7, %v292_v53 }
  0x35   : > { %v2052_v15 = vpack.c.bf16 %v2021_v8, %v2020_v6  ;;  %v528_v16 = vrot.slane %v429_v9, 2  ;;  %v529_v24 = vrot.slane %v430_v10, 2  ;;  %v926_v25 = vmul.f32 %v3277_v22, %v3367_v56 }
  0x36   : > { %v531_v26 = vrot.slane %v431_v11, 2  ;;  %v777_v27 = vrot.slane %v678_v12, 4  ;;  %v778_v28 = vrot.slane %v679_v13, 4  ;;  %v780_v29 = vrot.slane %v680_v14, 4  ;;  %v245_v12 = vld [vmem:[%s3238_s9 + $0x90] sm:$0xff] }
  0x37   : > { %2921 = vmatprep.mubr.msk.bf16.mxu0 %vm2069_vm3, %v2052_v15  ;;  %v530_v30 = vsel %vm522_vm1, %v528_v16, %v529_v24  ;;  %v927_v32 = vmul.f32 %v3277_v22, %v3369_v57  ;;  %v999_v33 = vmul.f32 %v3291_v31, %v3367_v56  ;;  %v1000_v34 = vmul.f32 %v3291_v31, %v3369_v57 }
  0x38   : > { %v532_v35 = vsel %vm522_vm1, %v529_v24, %v531_v26  ;;  %v637_v37 = vadd.f32 %v530_v30, %v356_v1  ;;  %v779_v38 = vsel %vm771_vm2, %v777_v27, %v778_v28  ;;  %v781_v39 = vsel %vm771_vm2, %v778_v28, %v780_v29  ;;  %v246_v28 = vld [vmem:[%s3238_s9 + $0x98] sm:$0xff]  ;;  %v247_v29 = vld [vmem:[%s3238_s9 + $0xa0] sm:$0xf] }
  0x39   : > { %v638_v40 = vadd.f32 %v532_v35, %v357_v4  ;;  %v1001_v41 = vmul.f32 %v3291_v31, %v3371_v61  ;;  %v1097_v42 = vrot.slane %v999_v33, 2  ;;  %v1098_v43 = vrot.slane %v1000_v34, 2 }
  0x3a   : > { %v886_v44 = vadd.f32 %v779_v38, %v637_v37  ;;  %v1247_v45 = vmul.f32 %v3301_v36, %v3367_v56  ;;  %v1248_v46 = vmul.f32 %v3301_v36, %v3369_v57  ;;  %v1249_v47 = vmul.f32 %v3301_v36, %v3371_v61 }
  0x3b   : > { %v887_v48 = vadd.f32 %v781_v39, %v638_v40  ;;  %v1099_v50 = vsel %vm522_vm1, %v1097_v42, %v1098_v43  ;;  %v1100_v51 = vrot.slane %v1001_v41, 2  ;;  %v1494_v52 = vmul.f32 %v3317_v49, %v3373_v63 }
  0x3c   : > { %v958_v53 = vadd.f32 %v926_v25, %v886_v44  ;;  %v1345_v54 = vrot.slane %v1247_v45, 4  ;;  %v1346_v55 = vrot.slane %v1248_v46, 4  ;;  %v1348_v59 = vrot.slane %v1249_v47, 4 }
  0x3d   : > { %v959_v60 = vadd.f32 %v927_v32, %v887_v48  ;;  %v1101_v1 = vsel %vm522_vm1, %v1098_v43, %v1100_v51  ;;  %v1495_v4 = vmul.f32 %v3317_v49, %v3375_v62  ;;  %v1567_v6 = vmul.f32 %v3327_v58, %v3373_v63 }
  0x3e   : > { %v1206_v8 = vadd.f32 %v1099_v50, %v958_v53  ;;  %v1347_v9 = vsel %vm771_vm2, %v1345_v54, %v1346_v55  ;;  %v1349_v10 = vsel %vm771_vm2, %v1346_v55, %v1348_v59  ;;  %v1568_v11 = vmul.f32 %v3327_v58, %v3375_v62 }
  0x3f   : > { %v1207_v13 = vadd.f32 %v1101_v1, %v959_v60  ;;  %v1569_v14 = vmul.f32 %v3327_v58, %v3377_v0  ;;  %v1665_v15 = vrot.slane %v1567_v6, 2  ;;  %v1815_v16 = vmul.f32 %v3336_v5, %v3373_v63 }
  0x40   : > { %v1454_v24 = vadd.f32 %v1347_v9, %v1206_v8  ;;  %v1666_v25 = vrot.slane %v1568_v11, 2  ;;  %v1816_v26 = vmul.f32 %v3336_v5, %v3375_v62  ;;  %v1817_v27 = vmul.f32 %v3336_v5, %v3377_v0 }
  0x41   : > { %v1455_v30 = vadd.f32 %v1349_v10, %v1207_v13  ;;  %v1668_v32 = vrot.slane %v1569_v14, 2  ;;  %v1913_v33 = vrot.slane %v1815_v16, 4  ;;  %v3431_v34 = vmax.f32 %v245_v12, 0.0 }
  0x42   : > { %v1526_v35 = vadd.f32 %v1494_v52, %v1454_v24  ;;  %v1667_v37 = vsel %vm522_vm1, %v1665_v15, %v1666_v25  ;;  %v1914_v38 = vrot.slane %v1816_v26, 4  ;;  %v1916_v39 = vrot.slane %v1817_v27, 4 }
  0x43   : > { %v1527_v40 = vadd.f32 %v1495_v4, %v1455_v30  ;;  %v1669_v41 = vsel %vm522_vm1, %v1666_v25, %v1668_v32  ;;  %v3435_v42 = vmax.f32 %v246_v28, 0.0  ;;  %v3437_v43 = vmax.f32 %v247_v29, 0.0 }
  0x44   : > { %v1774_v44 = vadd.f32 %v1667_v37, %v1526_v35  ;;  %v1915_v45 = vsel %vm771_vm2, %v1913_v33, %v1914_v38  ;;  %v1917_v46 = vsel %vm771_vm2, %v1914_v38, %v1916_v39  ;;  %v358_v47 = vmul.f32 %v3243_v2, %v3264_v17 }
  0x45   : > { %v1775_v48 = vadd.f32 %v1669_v41, %v1527_v40  ;;  %v359_v50 = vmul.f32 %v3243_v2, %v3266_v18  ;;  %v432_v51 = vmul.f32 %v3248_v3, %v3264_v17  ;;  %v433_v52 = vmul.f32 %v3248_v3, %v3266_v18 }
  0x46   : > { %v2022_v53 = vadd.f32 %v1915_v45, %v1774_v44  ;;  %v434_v54 = vmul.f32 %v3248_v3, %v3268_v19  ;;  %v681_v55 = vmul.f32 %v3256_v7, %v3264_v17  ;;  %v682_v59 = vmul.f32 %v3256_v7, %v3266_v18 }
  0x47   : > { %v2023_v60 = vadd.f32 %v1917_v46, %v1775_v48  ;;  %v533_v1 = vrot.slane %v432_v51, 2  ;;  %v534_v4 = vrot.slane %v433_v52, 2  ;;  %v683_v6 = vmul.f32 %v3256_v7, %v3268_v19 }
  0x48   : > { %v536_v8 = vrot.slane %v434_v54, 2  ;;  %v782_v9 = vrot.slane %v681_v55, 4  ;;  %v783_v10 = vrot.slane %v682_v59, 4  ;;  %v928_v11 = vmul.f32 %v3277_v22, %v3270_v20 }
  0x49   : > { %v2053_v12 = vpack.c.bf16 %v2023_v60, %v2022_v53  ;;  %v535_v13 = vsel %vm522_vm1, %v533_v1, %v534_v4  ;;  %v785_v14 = vrot.slane %v683_v6, 4  ;;  %v929_v17 = vmul.f32 %v3277_v22, %v3272_v21  ;;  %v248_v1 = vld [vmem:[%s3238_s9 + $0xa8] sm:$0xff] }
  0x4a   : > { %v537_v18 = vsel %vm522_vm1, %v534_v4, %v536_v8  ;;  %v639_v15 = vadd.f32 %v535_v13, %v358_v47  ;;  %v784_v16 = vsel %vm771_vm2, %v782_v9, %v783_v10  ;;  %v1002_v19 = vmul.f32 %v3291_v31, %v3270_v20 }
  0x4b   : > { %2922 = vmatmul.mubr.msk.bf16.vlgmr.msra.gmra.mxu0 %vm2069_vm3, %v2053_v12  ;;  %v640_v24 = vadd.f32 %v537_v18, %v359_v50  ;;  %v786_v25 = vsel %vm771_vm2, %v783_v10, %v785_v14  ;;  %v1003_v26 = vmul.f32 %v3291_v31, %v3272_v21  ;;  %v1004_v27 = vmul.f32 %v3291_v31, %v3279_v23  ;;  %v249_v14 = vld [vmem:[%s3238_s9 + $0xb0] sm:$0xff] }
  0x4c   : > { %v888_v28 = vadd.f32 %v784_v16, %v639_v15  ;;  %v1102_v29 = vrot.slane %v1002_v19, 2  ;;  %v1250_v30 = vmul.f32 %v3301_v36, %v3270_v20  ;;  %v1251_v32 = vmul.f32 %v3301_v36, %v3272_v21 }
  0x4d   : > { %v889_v33 = vadd.f32 %v786_v25, %v640_v24  ;;  %v1103_v35 = vrot.slane %v1003_v26, 2  ;;  %v1105_v37 = vrot.slane %v1004_v27, 2  ;;  %v1252_v38 = vmul.f32 %v3301_v36, %v3279_v23 }
  0x4e   : > { %v960_v39 = vadd.f32 %v928_v11, %v888_v28  ;;  %v1350_v40 = vrot.slane %v1250_v30, 4  ;;  %v1351_v41 = vrot.slane %v1251_v32, 4  ;;  %v1496_v44 = vmul.f32 %v3317_v49, %v3431_v34 }
  0x4f   : > { %v961_v45 = vadd.f32 %v929_v17, %v889_v33  ;;  %v1104_v46 = vsel %vm522_vm1, %v1102_v29, %v1103_v35  ;;  %v1106_v47 = vsel %vm522_vm1, %v1103_v35, %v1105_v37  ;;  %v1353_v48 = vrot.slane %v1252_v38, 4  ;;  %v250_v17 = vld [vmem:[%s3238_s9 + $0xb8] sm:$0xf] }
  0x50   : > { %v1208_v50 = vadd.f32 %v1104_v46, %v960_v39  ;;  %v1352_v51 = vsel %vm771_vm2, %v1350_v40, %v1351_v41  ;;  %v1497_v52 = vmul.f32 %v3317_v49, %v3435_v42  ;;  %v1570_v53 = vmul.f32 %v3327_v58, %v3431_v34 }
  0x51   : > { %v1209_v54 = vadd.f32 %v1106_v47, %v961_v45  ;;  %v1354_v55 = vsel %vm771_vm2, %v1351_v41, %v1353_v48  ;;  %v1571_v59 = vmul.f32 %v3327_v58, %v3435_v42  ;;  %v1572_v60 = vmul.f32 %v3327_v58, %v3437_v43 }
  0x52   : > { %v1456_v4 = vadd.f32 %v1352_v51, %v1208_v50  ;;  %v1670_v6 = vrot.slane %v1570_v53, 2  ;;  %v1818_v8 = vmul.f32 %v3336_v5, %v3431_v34  ;;  %v1819_v9 = vmul.f32 %v3336_v5, %v3435_v42 }
  0x53   : > { %v1457_v10 = vadd.f32 %v1354_v55, %v1209_v54  ;;  %v1671_v11 = vrot.slane %v1571_v59, 2  ;;  %v1673_v12 = vrot.slane %v1572_v60, 2  ;;  %v1820_v13 = vmul.f32 %v3336_v5, %v3437_v43 }
  0x54   : > { %v1528_v18 = vadd.f32 %v1496_v44, %v1456_v4  ;;  %v1918_v15 = vrot.slane %v1818_v8, 4  ;;  %v1919_v16 = vrot.slane %v1819_v9, 4  ;;  %v3501_v19 = vmax.f32 %v248_v1, 0.0 }
  0x55   : > { %v1529_v24 = vadd.f32 %v1497_v52, %v1457_v10  ;;  %v1672_v25 = vsel %vm522_vm1, %v1670_v6, %v1671_v11  ;;  %v1674_v26 = vsel %vm522_vm1, %v1671_v11, %v1673_v12  ;;  %v1921_v27 = vrot.slane %v1820_v13, 4 }
  0x56   : > { %v1776_v28 = vadd.f32 %v1672_v25, %v1528_v18  ;;  %v1920_v29 = vsel %vm771_vm2, %v1918_v15, %v1919_v16  ;;  %v3506_v30 = vmax.f32 %v249_v14, 0.0  ;;  %v3508_v32 = vmax.f32 %v250_v17, 0.0 }
  0x57   : > { %v1777_v33 = vadd.f32 %v1674_v26, %v1529_v24  ;;  %v1922_v35 = vsel %vm771_vm2, %v1919_v16, %v1921_v27  ;;  %v360_v37 = vmul.f32 %v3243_v2, %v3367_v56  ;;  %v361_v38 = vmul.f32 %v3243_v2, %v3369_v57 }
  0x58   : > { %v2024_v39 = vadd.f32 %v1920_v29, %v1776_v28  ;;  %v435_v40 = vmul.f32 %v3248_v3, %v3367_v56  ;;  %v436_v41 = vmul.f32 %v3248_v3, %v3369_v57  ;;  %v437_v44 = vmul.f32 %v3248_v3, %v3371_v61 }
  0x59   : > { %v2025_v45 = vadd.f32 %v1922_v35, %v1777_v33  ;;  %v684_v46 = vmul.f32 %v3256_v7, %v3367_v56  ;;  %v685_v47 = vmul.f32 %v3256_v7, %v3369_v57  ;;  %v686_v48 = vmul.f32 %v3256_v7, %v3371_v61 }
  0x5a   : > { %v538_v50 = vrot.slane %v435_v40, 2  ;;  %v539_v51 = vrot.slane %v436_v41, 2  ;;  %v541_v52 = vrot.slane %v437_v44, 2  ;;  %v930_v53 = vmul.f32 %v3277_v22, %v3373_v63 }
  0x5b   : > { %v2054_v54 = vpack.c.bf16 %v2025_v45, %v2024_v39  ;;  %v787_v55 = vrot.slane %v684_v46, 4  ;;  %v788_v59 = vrot.slane %v685_v47, 4  ;;  %v790_v60 = vrot.slane %v686_v48, 4  ;;  %v251_v46 = vld [vmem:[%s3238_s9 + $0xc0] sm:$0xff] }
  0x5c   : > { %v540_v1 = vsel %vm522_vm1, %v538_v50, %v539_v51  ;;  %v542_v56 = vsel %vm522_vm1, %v539_v51, %v541_v52  ;;  %v931_v57 = vmul.f32 %v3277_v22, %v3375_v62  ;;  %v1005_v61 = vmul.f32 %v3291_v31, %v3373_v63 }
  0x5d   : > { %2925 = vmatprep.mubr.msk.bf16.mxu0 %vm2069_vm3, %v2054_v54  ;;  %v641_v4 = vadd.f32 %v540_v1, %v360_v37  ;;  %v642_v6 = vadd.f32 %v542_v56, %v361_v38  ;;  %v789_v8 = vsel %vm771_vm2, %v787_v55, %v788_v59  ;;  %v791_v9 = vsel %vm771_vm2, %v788_v59, %v790_v60  ;;  %v252_v59 = vld [vmem:[%s3238_s9 + $0xc8] sm:$0xff]  ;;  %v253_v60 = vld [vmem:[%s3238_s9 + $0xd0] sm:$0xf] }
  0x5e   : > { %v1006_v10 = vmul.f32 %v3291_v31, %v3375_v62  ;;  %v1007_v11 = vmul.f32 %v3291_v31, %v3377_v0  ;;  %v1107_v12 = vrot.slane %v1005_v61, 2  ;;  %v1253_v13 = vmul.f32 %v3301_v36, %v3373_v63 }
  0x5f   : > { %v890_v14 = vadd.f32 %v789_v8, %v641_v4  ;;  %v891_v17 = vadd.f32 %v791_v9, %v642_v6  ;;  %v1254_v18 = vmul.f32 %v3301_v36, %v3375_v62  ;;  %v1255_v15 = vmul.f32 %v3301_v36, %v3377_v0 }
  0x60   : > { %v1108_v16 = vrot.slane %v1006_v10, 2  ;;  %v1110_v24 = vrot.slane %v1007_v11, 2  ;;  %v1355_v25 = vrot.slane %v1253_v13, 4  ;;  %v1498_v26 = vmul.f32 %v3317_v49, %v3501_v19 }
  0x61   : > { %v962_v27 = vadd.f32 %v930_v53, %v890_v14  ;;  %v963_v28 = vadd.f32 %v931_v57, %v891_v17  ;;  %v1356_v29 = vrot.slane %v1254_v18, 4  ;;  %v1358_v33 = vrot.slane %v1255_v15, 4 }
  0x62   : > { %v1109_v35 = vsel %vm522_vm1, %v1107_v12, %v1108_v16  ;;  %v1111_v37 = vsel %vm522_vm1, %v1108_v16, %v1110_v24  ;;  %v1499_v38 = vmul.f32 %v3317_v49, %v3506_v30  ;;  %v1573_v39 = vmul.f32 %v3327_v58, %v3501_v19 }
  0x63   : > { %v1210_v40 = vadd.f32 %v1109_v35, %v962_v27  ;;  %v1211_v41 = vadd.f32 %v1111_v37, %v963_v28  ;;  %v1357_v44 = vsel %vm771_vm2, %v1355_v25, %v1356_v29  ;;  %v1359_v45 = vsel %vm771_vm2, %v1356_v29, %v1358_v33 }
  0x64   : > { %v1574_v47 = vmul.f32 %v3327_v58, %v3506_v30  ;;  %v1575_v48 = vmul.f32 %v3327_v58, %v3508_v32  ;;  %v1675_v50 = vrot.slane %v1573_v39, 2  ;;  %v1821_v51 = vmul.f32 %v3336_v5, %v3501_v19 }
  0x65   : > { %v1458_v52 = vadd.f32 %v1357_v44, %v1210_v40  ;;  %v1459_v53 = vadd.f32 %v1359_v45, %v1211_v41  ;;  %v1822_v54 = vmul.f32 %v3336_v5, %v3506_v30  ;;  %v1823_v55 = vmul.f32 %v3336_v5, %v3508_v32 }
  0x66   : > { %v1676_v1 = vrot.slane %v1574_v47, 2  ;;  %v1678_v56 = vrot.slane %v1575_v48, 2  ;;  %v1923_v57 = vrot.slane %v1821_v51, 4  ;;  %v3571_v61 = vmax.f32 %v251_v46, 0.0 }
  0x67   : > { %v1530_v4 = vadd.f32 %v1498_v26, %v1458_v52  ;;  %v1531_v6 = vadd.f32 %v1499_v38, %v1459_v53  ;;  %v1924_v8 = vrot.slane %v1822_v54, 4  ;;  %v1926_v9 = vrot.slane %v1823_v55, 4 }
  0x68   : > { %v1677_v10 = vsel %vm522_vm1, %v1675_v50, %v1676_v1  ;;  %v1679_v11 = vsel %vm522_vm1, %v1676_v1, %v1678_v56  ;;  %v3575_v12 = vmax.f32 %v252_v59, 0.0  ;;  %v3577_v13 = vmax.f32 %v253_v60, 0.0 }
  0x69   : > { %v1778_v14 = vadd.f32 %v1677_v10, %v1530_v4  ;;  %v1779_v17 = vadd.f32 %v1679_v11, %v1531_v6  ;;  %v1925_v18 = vsel %vm771_vm2, %v1923_v57, %v1924_v8  ;;  %v1927_v15 = vsel %vm771_vm2, %v1924_v8, %v1926_v9 }
  0x6a   : > { %v362_v16 = vmul.f32 %v3243_v2, %v3270_v20  ;;  %v363_v24 = vmul.f32 %v3243_v2, %v3272_v21  ;;  %v438_v25 = vmul.f32 %v3248_v3, %v3270_v20  ;;  %v439_v26 = vmul.f32 %v3248_v3, %v3272_v21 }
  0x6b   : > { %v2026_v27 = vadd.f32 %v1925_v18, %v1778_v14  ;;  %v2027_v28 = vadd.f32 %v1927_v15, %v1779_v17  ;;  %v440_v29 = vmul.f32 %v3248_v3, %v3279_v23  ;;  %v687_v33 = vmul.f32 %v3256_v7, %v3270_v20 }
  0x6c   : > { %v543_v35 = vrot.slane %v438_v25, 2  ;;  %v544_v37 = vrot.slane %v439_v26, 2  ;;  %v688_v38 = vmul.f32 %v3256_v7, %v3272_v21  ;;  %v689_v39 = vmul.f32 %v3256_v7, %v3279_v23 }
  0x6d   : > { %v2055_v40 = vpack.c.bf16 %v2027_v28, %v2026_v27  ;;  %v546_v41 = vrot.slane %v440_v29, 2  ;;  %v792_v44 = vrot.slane %v687_v33, 4  ;;  %v932_v45 = vmul.f32 %v3277_v22, %v3431_v34 }
  0x6e   : > { %v545_v46 = vsel %vm522_vm1, %v543_v35, %v544_v37  ;;  %v793_v47 = vrot.slane %v688_v38, 4  ;;  %v795_v48 = vrot.slane %v689_v39, 4  ;;  %v933_v20 = vmul.f32 %v3277_v22, %v3435_v42 }
  0x6f   : > { %2926 = vmatmul.mubr.msk.bf16.gmra.mxu0 %vm2069_vm3, %v2055_v40  ;;  %v547_v21 = vsel %vm522_vm1, %v544_v37, %v546_v41  ;;  %v643_v50 = vadd.f32 %v545_v46, %v362_v16  ;;  %v1008_v23 = vmul.f32 %v3291_v31, %v3431_v34  ;;  %v1009_v51 = vmul.f32 %v3291_v31, %v3435_v42  ;;  %v254_v37 = vld [vmem:[%s3238_s9 + $0xd8] sm:$0xff] }
  0x70   : > { %v644_v52 = vadd.f32 %v547_v21, %v363_v24  ;;  %v794_v53 = vsel %vm771_vm2, %v792_v44, %v793_v47  ;;  %v796_v54 = vsel %vm771_vm2, %v793_v47, %v795_v48  ;;  %v1010_v55 = vmul.f32 %v3291_v31, %v3437_v43  ;;  %v255_v48 = vld [vmem:[%s3238_s9 + $0xe0] sm:$0xff] }
  0x71   : > { %v892_v59 = vadd.f32 %v794_v53, %v643_v50  ;;  %v1112_v60 = vrot.slane %v1008_v23, 2  ;;  %v1113_v1 = vrot.slane %v1009_v51, 2  ;;  %v1256_v56 = vmul.f32 %v3301_v36, %v3431_v34 }
  0x72   : > { %v893_v57 = vadd.f32 %v796_v54, %v644_v52  ;;  %v1115_v4 = vrot.slane %v1010_v55, 2  ;;  %v1257_v6 = vmul.f32 %v3301_v36, %v3435_v42  ;;  %v1258_v8 = vmul.f32 %v3301_v36, %v3437_v43 }
  0x73   : > { %v964_v9 = vadd.f32 %v932_v45, %v892_v59  ;;  %v1114_v10 = vsel %vm522_vm1, %v1112_v60, %v1113_v1  ;;  %v1360_v11 = vrot.slane %v1256_v56, 4  ;;  %v1500_v14 = vmul.f32 %v3317_v49, %v3571_v61 }
  0x74   : > { %v965_v17 = vadd.f32 %v933_v20, %v893_v57  ;;  %v1116_v18 = vsel %vm522_vm1, %v1113_v1, %v1115_v4  ;;  %v1361_v15 = vrot.slane %v1257_v6, 4  ;;  %v1363_v16 = vrot.slane %v1258_v8, 4  ;;  %v256_v20 = vld [vmem:[%s3238_s9 + $0xe8] sm:$0xf] }
  0x75   : > { %v1212_v24 = vadd.f32 %v1114_v10, %v964_v9  ;;  %v1501_v25 = vmul.f32 %v3317_v49, %v3575_v12  ;;  %v1576_v26 = vmul.f32 %v3327_v58, %v3571_v61  ;;  %v1577_v27 = vmul.f32 %v3327_v58, %v3575_v12 }
  0x76   : > { %v1213_v28 = vadd.f32 %v1116_v18, %v965_v17  ;;  %v1362_v29 = vsel %vm771_vm2, %v1360_v11, %v1361_v15  ;;  %v1364_v33 = vsel %vm771_vm2, %v1361_v15, %v1363_v16  ;;  %v1578_v35 = vmul.f32 %v3327_v58, %v3577_v13 }
  0x77   : > { %v1460_v38 = vadd.f32 %v1362_v29, %v1212_v24  ;;  %v1680_v39 = vrot.slane %v1576_v26, 2  ;;  %v1681_v40 = vrot.slane %v1577_v27, 2  ;;  %v1824_v41 = vmul.f32 %v3336_v5, %v3571_v61 }
  0x78   : > { %v1461_v44 = vadd.f32 %v1364_v33, %v1213_v28  ;;  %v1683_v45 = vrot.slane %v1578_v35, 2  ;;  %v1825_v46 = vmul.f32 %v3336_v5, %v3575_v12  ;;  %v1826_v47 = vmul.f32 %v3336_v5, %v3577_v13 }
  0x79   : > { %v1532_v21 = vadd.f32 %v1500_v14, %v1460_v38  ;;  %v1682_v50 = vsel %vm522_vm1, %v1680_v39, %v1681_v40  ;;  %v1928_v23 = vrot.slane %v1824_v41, 4  ;;  %v3642_v51 = vmax.f32 %v254_v37, 0.0 }
  0x7a   : > { %v1533_v52 = vadd.f32 %v1501_v25, %v1461_v44  ;;  %v1684_v53 = vsel %vm522_vm1, %v1681_v40, %v1683_v45  ;;  %v1929_v54 = vrot.slane %v1825_v46, 4  ;;  %v1931_v55 = vrot.slane %v1826_v47, 4 }
  0x7b   : > { %v1780_v59 = vadd.f32 %v1682_v50, %v1532_v21  ;;  %v3645_v60 = vmax.f32 %v255_v48, 0.0  ;;  %v3647_v1 = vmax.f32 %v256_v20, 0.0  ;;  %v364_v56 = vmul.f32 %v3243_v2, %v3373_v63 }
  0x7c   : > { %v1781_v57 = vadd.f32 %v1684_v53, %v1533_v52  ;;  %v1930_v4 = vsel %vm771_vm2, %v1928_v23, %v1929_v54  ;;  %v1932_v6 = vsel %vm771_vm2, %v1929_v54, %v1931_v55  ;;  %v365_v8 = vmul.f32 %v3243_v2, %v3375_v62 }
  0x7d   : > { %v2028_v9 = vadd.f32 %v1930_v4, %v1780_v59  ;;  %v441_v10 = vmul.f32 %v3248_v3, %v3373_v63  ;;  %v442_v11 = vmul.f32 %v3248_v3, %v3375_v62  ;;  %v443_v14 = vmul.f32 %v3248_v3, %v3377_v0 }
  0x7e   : > { %v2029_v17 = vadd.f32 %v1932_v6, %v1781_v57  ;;  %v690_v18 = vmul.f32 %v3256_v7, %v3373_v63  ;;  %v691_v15 = vmul.f32 %v3256_v7, %v3375_v62  ;;  %v692_v16 = vmul.f32 %v3256_v7, %v3377_v0 }
  0x7f   : > { %v548_v24 = vrot.slane %v441_v10, 2  ;;  %v549_v25 = vrot.slane %v442_v11, 2  ;;  %v551_v26 = vrot.slane %v443_v14, 2  ;;  %v934_v27 = vmul.f32 %v3277_v22, %v3501_v19 }
  0x80   : > { %v2056_v28 = vpack.c.bf16 %v2029_v17, %v2028_v9  ;;  %v797_v29 = vrot.slane %v690_v18, 4  ;;  %v798_v33 = vrot.slane %v691_v15, 4  ;;  %v800_v35 = vrot.slane %v692_v16, 4  ;;  %v257_v18 = vld [vmem:[%s3238_s9 + $0xf0] sm:$0xff] }
  0x81   : > { %v550_v37 = vsel %vm522_vm1, %v548_v24, %v549_v25  ;;  %v552_v63 = vsel %vm522_vm1, %v549_v25, %v551_v26  ;;  %v935_v62 = vmul.f32 %v3277_v22, %v3506_v30  ;;  %v1011_v0 = vmul.f32 %v3291_v31, %v3501_v19 }
  0x82   : > { %2929 = vmatprep.mubr.msk.bf16.mxu0 %vm2069_vm3, %v2056_v28  ;;  %v645_v38 = vadd.f32 %v550_v37, %v364_v56  ;;  %v646_v39 = vadd.f32 %v552_v63, %v365_v8  ;;  %v799_v40 = vsel %vm771_vm2, %v797_v29, %v798_v33  ;;  %v801_v41 = vsel %vm771_vm2, %v798_v33, %v800_v35  ;;  %v258_v33 = vld [vmem:[%s3238_s9 + $0xf8] sm:$0xff]  ;;  %v259_v35 = vld [vmem:[%s3238_s9 + $0x100] sm:$0xf] }
  0x83   : > { %v1012_v44 = vmul.f32 %v3291_v31, %v3506_v30  ;;  %v1013_v45 = vmul.f32 %v3291_v31, %v3508_v32  ;;  %v1117_v46 = vrot.slane %v1011_v0, 2  ;;  %v1259_v47 = vmul.f32 %v3301_v36, %v3501_v19 }
  0x84   : > { %v894_v48 = vadd.f32 %v799_v40, %v645_v38  ;;  %v895_v20 = vadd.f32 %v801_v41, %v646_v39  ;;  %v1260_v21 = vmul.f32 %v3301_v36, %v3506_v30  ;;  %v1261_v50 = vmul.f32 %v3301_v36, %v3508_v32 }
  0x85   : > { %v1118_v23 = vrot.slane %v1012_v44, 2  ;;  %v1120_v52 = vrot.slane %v1013_v45, 2  ;;  %v1365_v53 = vrot.slane %v1259_v47, 4  ;;  %v1502_v54 = vmul.f32 %v3317_v49, %v3642_v51 }
  0x86   : > { %v966_v55 = vadd.f32 %v934_v27, %v894_v48  ;;  %v967_v59 = vadd.f32 %v935_v62, %v895_v20  ;;  %v1366_v56 = vrot.slane %v1260_v21, 4  ;;  %v1368_v57 = vrot.slane %v1261_v50, 4 }
  0x87   : > { %v1119_v4 = vsel %vm522_vm1, %v1117_v46, %v1118_v23  ;;  %v1121_v6 = vsel %vm522_vm1, %v1118_v23, %v1120_v52  ;;  %v1503_v8 = vmul.f32 %v3317_v49, %v3645_v60  ;;  %v1579_v9 = vmul.f32 %v3327_v58, %v3642_v51 }
  0x88   : > { %v1214_v10 = vadd.f32 %v1119_v4, %v966_v55  ;;  %v1215_v11 = vadd.f32 %v1121_v6, %v967_v59  ;;  %v1367_v14 = vsel %vm771_vm2, %v1365_v53, %v1366_v56  ;;  %v1369_v17 = vsel %vm771_vm2, %v1366_v56, %v1368_v57 }
  0x89   : > { %v1580_v15 = vmul.f32 %v3327_v58, %v3645_v60  ;;  %v1581_v16 = vmul.f32 %v3327_v58, %v3647_v1  ;;  %v1685_v24 = vrot.slane %v1579_v9, 2  ;;  %v1827_v25 = vmul.f32 %v3336_v5, %v3642_v51 }
  0x8a   : > { %v1462_v26 = vadd.f32 %v1367_v14, %v1214_v10  ;;  %v1463_v27 = vadd.f32 %v1369_v17, %v1215_v11  ;;  %v1828_v28 = vmul.f32 %v3336_v5, %v3645_v60  ;;  %v1829_v29 = vmul.f32 %v3336_v5, %v3647_v1 }
  0x8b   : > { %v1686_v37 = vrot.slane %v1580_v15, 2  ;;  %v1688_v63 = vrot.slane %v1581_v16, 2  ;;  %v1933_v62 = vrot.slane %v1827_v25, 4  ;;  %v3711_v0 = vmax.f32 %v257_v18, 0.0 }
  0x8c   : > { %v1534_v38 = vadd.f32 %v1502_v54, %v1462_v26  ;;  %v1535_v39 = vadd.f32 %v1503_v8, %v1463_v27  ;;  %v1934_v40 = vrot.slane %v1828_v28, 4  ;;  %v1936_v41 = vrot.slane %v1829_v29, 4 }
  0x8d   : > { %v1687_v44 = vsel %vm522_vm1, %v1685_v24, %v1686_v37  ;;  %v1689_v45 = vsel %vm522_vm1, %v1686_v37, %v1688_v63  ;;  %v3715_v46 = vmax.f32 %v258_v33, 0.0  ;;  %v3717_v47 = vmax.f32 %v259_v35, 0.0 }
  0x8e   : > { %v1782_v48 = vadd.f32 %v1687_v44, %v1534_v38  ;;  %v1783_v20 = vadd.f32 %v1689_v45, %v1535_v39  ;;  %v1935_v21 = vsel %vm771_vm2, %v1933_v62, %v1934_v40  ;;  %v1937_v50 = vsel %vm771_vm2, %v1934_v40, %v1936_v41 }
  0x8f   : > { %v366_v23 = vmul.f32 %v3243_v2, %v3431_v34  ;;  %v367_v52 = vmul.f32 %v3243_v2, %v3435_v42  ;;  %v444_v53 = vmul.f32 %v3248_v3, %v3431_v34  ;;  %v445_v54 = vmul.f32 %v3248_v3, %v3435_v42 }
  0x90   : > { %v2030_v55 = vadd.f32 %v1935_v21, %v1782_v48  ;;  %v2031_v59 = vadd.f32 %v1937_v50, %v1783_v20  ;;  %v446_v56 = vmul.f32 %v3248_v3, %v3437_v43  ;;  %v693_v57 = vmul.f32 %v3256_v7, %v3431_v34 }
  0x91   : > { %v553_v4 = vrot.slane %v444_v53, 2  ;;  %v554_v6 = vrot.slane %v445_v54, 2  ;;  %v694_v8 = vmul.f32 %v3256_v7, %v3435_v42  ;;  %v695_v2 = vmul.f32 %v3256_v7, %v3437_v43  ;;  %v260_v54 = vld [vmem:[%s3238_s9 + $0x108] sm:$0xff] }
  0x92   : > { %v2057_v9 = vpack.c.bf16 %v2031_v59, %v2030_v55  ;;  %v556_v10 = vrot.slane %v446_v56, 2  ;;  %v802_v11 = vrot.slane %v693_v57, 4  ;;  %v936_v14 = vmul.f32 %v3277_v22, %v3571_v61 }
  0x93   : > { %v555_v17 = vsel %vm522_vm1, %v553_v4, %v554_v6  ;;  %v803_v3 = vrot.slane %v694_v8, 4  ;;  %v805_v18 = vrot.slane %v695_v2, 4  ;;  %v937_v34 = vmul.f32 %v3277_v22, %v3575_v12  ;;  %v261_v2 = vld [vmem:[%s3238_s9 + $0x110] sm:$0xff] }
  0x94   : > { %2930 = vmatmul.mubr.msk.bf16.gmra.mxu0 %vm2069_vm3, %v2057_v9  ;;  %v557_v42 = vsel %vm522_vm1, %v554_v6, %v556_v10  ;;  %v647_v15 = vadd.f32 %v555_v17, %v366_v23  ;;  %v1014_v7 = vmul.f32 %v3291_v31, %v3571_v61  ;;  %v1015_v43 = vmul.f32 %v3291_v31, %v3575_v12  ;;  %v262_v9 = vld [vmem:[%s3238_s9 + $0x118] sm:$0xf] }
  0x95   : > { %v648_v16 = vadd.f32 %v557_v42, %v367_v52  ;;  %v804_v24 = vsel %vm771_vm2, %v802_v11, %v803_v3  ;;  %v806_v25 = vsel %vm771_vm2, %v803_v3, %v805_v18  ;;  %v1016_v26 = vmul.f32 %v3291_v31, %v3577_v13 }
  0x96   : > { %v896_v22 = vadd.f32 %v804_v24, %v647_v15  ;;  %v1122_v27 = vrot.slane %v1014_v7, 2  ;;  %v1123_v28 = vrot.slane %v1015_v43, 2  ;;  %v1262_v29 = vmul.f32 %v3301_v36, %v3571_v61 }
  0x97   : > { %v897_v33 = vadd.f32 %v806_v25, %v648_v16  ;;  %v1125_v35 = vrot.slane %v1016_v26, 2  ;;  %v1263_v37 = vmul.f32 %v3301_v36, %v3575_v12  ;;  %v1264_v63 = vmul.f32 %v3301_v36, %v3577_v13 }
  0x98   : > { %v968_v62 = vadd.f32 %v936_v14, %v896_v22  ;;  %v1124_v38 = vsel %vm522_vm1, %v1122_v27, %v1123_v28  ;;  %v1370_v39 = vrot.slane %v1262_v29, 4  ;;  %v1504_v31 = vmul.f32 %v3317_v49, %v3711_v0  ;;  %v3803_v27 = vld [vmem:[%s4634_s1 + $0x1] ss:$0 sm:$0xff] }
  0x99   : > { %v969_v40 = vadd.f32 %v937_v34, %v897_v33  ;;  %v1126_v41 = vsel %vm522_vm1, %v1123_v28, %v1125_v35  ;;  %v1371_v44 = vrot.slane %v1263_v37, 4  ;;  %v1373_v45 = vrot.slane %v1264_v63, 4  ;;  %v3814_v37 = vld [vmem:[%s4634_s1 + $0x2] ss:$0 sm:$0xff] }
  0x9a   : > { %v1216_v48 = vadd.f32 %v1124_v38, %v968_v62  ;;  %v1505_v20 = vmul.f32 %v3317_v49, %v3715_v46  ;;  %v1582_v36 = vmul.f32 %v3327_v58, %v3711_v0  ;;  %v1583_v21 = vmul.f32 %v3327_v58, %v3715_v46 }
  0x9b   : > { %v1217_v50 = vadd.f32 %v1126_v41, %v969_v40  ;;  %v1372_v23 = vsel %vm771_vm2, %v1370_v39, %v1371_v44  ;;  %v1374_v52 = vsel %vm771_vm2, %v1371_v44, %v1373_v45  ;;  %v1584_v53 = vmul.f32 %v3327_v58, %v3717_v47  ;;  %v3825_v41 = vld [vmem:[%s4634_s1 + $0x3] ss:$0 sm:$0xff] }
  0x9c   : > { %v1464_v55 = vadd.f32 %v1372_v23, %v1216_v48  ;;  %v1690_v59 = vrot.slane %v1582_v36, 2  ;;  %v1691_v49 = vrot.slane %v1583_v21, 2  ;;  %v1830_v56 = vmul.f32 %v3336_v5, %v3711_v0  ;;  %v3836_v21 = vld [vmem:[%s4634_s1 + $0x4] ss:$0 sm:$0xff] }
  0x9d   : > { %v1465_v57 = vadd.f32 %v1374_v52, %v1217_v50  ;;  %v1693_v4 = vrot.slane %v1584_v53, 2  ;;  %v1831_v6 = vmul.f32 %v3336_v5, %v3715_v46  ;;  %v1832_v8 = vmul.f32 %v3336_v5, %v3717_v47  ;;  %v3792_v5 = vld [vmem:[%s4634_s1] ss:$0 sm:$0xff] }
  0x9e   : > { %v1536_v10 = vadd.f32 %v1504_v31, %v1464_v55  ;;  %v1692_v58 = vsel %vm522_vm1, %v1690_v59, %v1691_v49  ;;  %v1938_v11 = vrot.slane %v1830_v56, 4  ;;  %v3782_v14 = vmax.f32 %v260_v54, 0.0  ;;  %v3850_v56 = vld [vmem:[%s4634_s1 + $0x5] ss:$0 sm:$0xff] }
  0x9f   : > { %v1537_v17 = vadd.f32 %v1505_v20, %v1465_v57  ;;  %v1694_v3 = vsel %vm522_vm1, %v1691_v49, %v1693_v4  ;;  %v1939_v18 = vrot.slane %v1831_v6, 4  ;;  %v1941_v34 = vrot.slane %v1832_v8, 4 }
  0xa0   : > { %v1784_v42 = vadd.f32 %v1692_v58, %v1536_v10  ;;  %v3785_v15 = vmax.f32 %v261_v2, 0.0  ;;  %v3787_v7 = vmax.f32 %v262_v9, 0.0  ;;  %v368_v43 = vmul.f32 %v3792_v5, %v3501_v19 }
  0xa1   : > { %v1785_v16 = vadd.f32 %v1694_v3, %v1537_v17  ;;  %v1940_v24 = vsel %vm771_vm2, %v1938_v11, %v1939_v18  ;;  %v1942_v25 = vsel %vm771_vm2, %v1939_v18, %v1941_v34  ;;  %v369_v26 = vmul.f32 %v3792_v5, %v3506_v30  ;;  %v3861_v11 = vld [vmem:[%s4634_s1 + $0x6] ss:$0 sm:$0xff] }
  0xa2   : > { %v2032_v22 = vadd.f32 %v1940_v24, %v1784_v42  ;;  %v447_v28 = vmul.f32 %v3803_v27, %v3501_v19  ;;  %v448_v29 = vmul.f32 %v3803_v27, %v3506_v30  ;;  %v449_v33 = vmul.f32 %v3803_v27, %v3508_v32 }
  0xa3   : > { %v2033_v35 = vadd.f32 %v1942_v25, %v1785_v16  ;;  %v696_v63 = vmul.f32 %v3814_v37, %v3501_v19  ;;  %v697_v62 = vmul.f32 %v3814_v37, %v3506_v30  ;;  %v698_v38 = vmul.f32 %v3814_v37, %v3508_v32  ;;  %v3872_v25 = vld [vmem:[%s4634_s1 + $0x7] ss:$0 sm:$0xff] }
  0xa4   : > { %v558_v39 = vrot.slane %v447_v28, 2  ;;  %v559_v31 = vrot.slane %v448_v29, 2  ;;  %v561_v40 = vrot.slane %v449_v33, 2  ;;  %v938_v44 = vmul.f32 %v3825_v41, %v3642_v51 }
  0xa5   : > { %v2058_v45 = vpack.c.bf16 %v2033_v35, %v2032_v22  ;;  %v807_v48 = vrot.slane %v696_v63, 4  ;;  %v808_v19 = vrot.slane %v697_v62, 4  ;;  %v810_v20 = vrot.slane %v698_v38, 4  ;;  %v263_v35 = vld [vmem:[%s3238_s9 + $0x120] sm:$0xff] }
  0xa6   : > { %v560_v30 = vsel %vm522_vm1, %v558_v39, %v559_v31  ;;  %v562_v36 = vsel %vm522_vm1, %v559_v31, %v561_v40  ;;  %v939_v32 = vmul.f32 %v3825_v41, %v3645_v60  ;;  %v1017_v50 = vmul.f32 %v3836_v21, %v3642_v51  ;;  %v3886_v39 = vld [vmem:[%s4634_s1 + $0x8] ss:$0 sm:$0xff] }
  0xa7   : > { %2933 = vmatprep.mubr.msk.bf16.mxu0 %vm2069_vm3, %v2058_v45  ;;  %v649_v23 = vadd.f32 %v560_v30, %v368_v43  ;;  %v650_v52 = vadd.f32 %v562_v36, %v369_v26  ;;  %v809_v53 = vsel %vm771_vm2, %v807_v48, %v808_v19  ;;  %v811_v54 = vsel %vm771_vm2, %v808_v19, %v810_v20  ;;  %v264_v19 = vld [vmem:[%s3238_s9 + $0x128] sm:$0xff]  ;;  %v265_v20 = vld [vmem:[%s3238_s9 + $0x130] sm:$0xf] }
  0xa8   : > { %v1018_v55 = vmul.f32 %v3836_v21, %v3645_v60  ;;  %v1019_v59 = vmul.f32 %v3836_v21, %v3647_v1  ;;  %v1127_v49 = vrot.slane %v1017_v50, 2  ;;  %v1265_v57 = vmul.f32 %v3850_v56, %v3642_v51 }
  0xa9   : > { %v898_v4 = vadd.f32 %v809_v53, %v649_v23  ;;  %v899_v6 = vadd.f32 %v811_v54, %v650_v52  ;;  %v1266_v8 = vmul.f32 %v3850_v56, %v3645_v60  ;;  %v1267_v2 = vmul.f32 %v3850_v56, %v3647_v1 }
  0xaa   : > { %v1128_v9 = vrot.slane %v1018_v55, 2  ;;  %v1130_v10 = vrot.slane %v1019_v59, 2  ;;  %v1375_v58 = vrot.slane %v1265_v57, 4  ;;  %v1506_v17 = vmul.f32 %v3861_v11, %v3782_v14 }
  0xab   : > { %v970_v3 = vadd.f32 %v938_v44, %v898_v4  ;;  %v971_v18 = vadd.f32 %v939_v32, %v899_v6  ;;  %v1376_v34 = vrot.slane %v1266_v8, 4  ;;  %v1378_v42 = vrot.slane %v1267_v2, 4 }
  0xac   : > { %v1129_v43 = vsel %vm522_vm1, %v1127_v49, %v1128_v9  ;;  %v1131_v16 = vsel %vm522_vm1, %v1128_v9, %v1130_v10  ;;  %v1507_v24 = vmul.f32 %v3861_v11, %v3785_v15  ;;  %v1585_v26 = vmul.f32 %v3872_v25, %v3782_v14 }
  0xad   : > { %v1218_v22 = vadd.f32 %v1129_v43, %v970_v3  ;;  %v1219_v28 = vadd.f32 %v1131_v16, %v971_v18  ;;  %v1377_v29 = vsel %vm771_vm2, %v1375_v58, %v1376_v34  ;;  %v1379_v33 = vsel %vm771_vm2, %v1376_v34, %v1378_v42 }
  0xae   : > { %v1586_v63 = vmul.f32 %v3872_v25, %v3785_v15  ;;  %v1587_v62 = vmul.f32 %v3872_v25, %v3787_v7  ;;  %v1695_v38 = vrot.slane %v1585_v26, 2  ;;  %v1833_v31 = vmul.f32 %v3886_v39, %v3782_v14 }
  0xaf   : > { %v1466_v40 = vadd.f32 %v1377_v29, %v1218_v22  ;;  %v1467_v44 = vadd.f32 %v1379_v33, %v1219_v28  ;;  %v1834_v45 = vmul.f32 %v3886_v39, %v3785_v15  ;;  %v1835_v48 = vmul.f32 %v3886_v39, %v3787_v7 }
  0xb0   : > { %v1696_v30 = vrot.slane %v1586_v63, 2  ;;  %v1698_v36 = vrot.slane %v1587_v62, 2  ;;  %v1943_v32 = vrot.slane %v1833_v31, 4  ;;  %v3896_v50 = vmax.f32 %v263_v35, 0.0 }
  0xb1   : > { %v1538_v23 = vadd.f32 %v1506_v17, %v1466_v40  ;;  %v1539_v52 = vadd.f32 %v1507_v24, %v1467_v44  ;;  %v1944_v53 = vrot.slane %v1834_v45, 4  ;;  %v1946_v54 = vrot.slane %v1835_v48, 4 }
  0xb2   : > { %v1697_v55 = vsel %vm522_vm1, %v1695_v38, %v1696_v30  ;;  %v1699_v59 = vsel %vm522_vm1, %v1696_v30, %v1698_v36  ;;  %v3900_v49 = vmax.f32 %v264_v19, 0.0  ;;  %v3902_v57 = vmax.f32 %v265_v20, 0.0 }
  0xb3   : > { %v1786_v4 = vadd.f32 %v1697_v55, %v1538_v23  ;;  %v1787_v6 = vadd.f32 %v1699_v59, %v1539_v52  ;;  %v1945_v8 = vsel %vm771_vm2, %v1943_v32, %v1944_v53  ;;  %v1947_v2 = vsel %vm771_vm2, %v1944_v53, %v1946_v54 }
  0xb4   : > { %v370_v9 = vmul.f32 %v3792_v5, %v3571_v61  ;;  %v371_v10 = vmul.f32 %v3792_v5, %v3575_v12  ;;  %v450_v58 = vmul.f32 %v3803_v27, %v3571_v61  ;;  %v451_v17 = vmul.f32 %v3803_v27, %v3575_v12 }
  0xb5   : > { %v2034_v3 = vadd.f32 %v1945_v8, %v1786_v4  ;;  %v2035_v18 = vadd.f32 %v1947_v2, %v1787_v6  ;;  %v452_v34 = vmul.f32 %v3803_v27, %v3577_v13  ;;  %v699_v42 = vmul.f32 %v3814_v37, %v3571_v61 }
  0xb6   : > { %v563_v43 = vrot.slane %v450_v58, 2  ;;  %v564_v16 = vrot.slane %v451_v17, 2  ;;  %v700_v24 = vmul.f32 %v3814_v37, %v3575_v12  ;;  %v701_v26 = vmul.f32 %v3814_v37, %v3577_v13 }
  0xb7   : > { %v2059_v22 = vpack.c.bf16 %v2035_v18, %v2034_v3  ;;  %v566_v28 = vrot.slane %v452_v34, 2  ;;  %v812_v29 = vrot.slane %v699_v42, 4  ;;  %v940_v33 = vmul.f32 %v3825_v41, %v3711_v0 }
  0xb8   : > { %v565_v35 = vsel %vm522_vm1, %v563_v43, %v564_v16  ;;  %v813_v63 = vrot.slane %v700_v24, 4  ;;  %v815_v62 = vrot.slane %v701_v26, 4  ;;  %v941_v61 = vmul.f32 %v3825_v41, %v3715_v46 }
  0xb9   : > { %2934 = vmatmul.mubr.msk.bf16.gmra.mxu0 %vm2069_vm3, %v2059_v22  ;;  %v567_v12 = vsel %vm522_vm1, %v564_v16, %v566_v28  ;;  %v651_v38 = vadd.f32 %v565_v35, %v370_v9  ;;  %v1020_v13 = vmul.f32 %v3836_v21, %v3711_v0  ;;  %v1021_v31 = vmul.f32 %v3836_v21, %v3715_v46  ;;  %v266_v16 = vld [vmem:[%s3238_s9 + $0x138] sm:$0xff] }
  0xba   : > { %v652_v40 = vadd.f32 %v567_v12, %v371_v10  ;;  %v814_v44 = vsel %vm771_vm2, %v812_v29, %v813_v63  ;;  %v816_v45 = vsel %vm771_vm2, %v813_v63, %v815_v62  ;;  %v1022_v48 = vmul.f32 %v3836_v21, %v3717_v47  ;;  %v267_v62 = vld [vmem:[%s3238_s9 + $0x140] sm:$0xff] }
  0xbb   : > { %v900_v19 = vadd.f32 %v814_v44, %v651_v38  ;;  %v1132_v20 = vrot.slane %v1020_v13, 2  ;;  %v1133_v30 = vrot.slane %v1021_v31, 2  ;;  %v1268_v36 = vmul.f32 %v3850_v56, %v3711_v0 }
  0xbc   : > { %v901_v32 = vadd.f32 %v816_v45, %v652_v40  ;;  %v1135_v23 = vrot.slane %v1022_v48, 2  ;;  %v1269_v52 = vmul.f32 %v3850_v56, %v3715_v46  ;;  %v1270_v53 = vmul.f32 %v3850_v56, %v3717_v47 }
  0xbd   : > { %v972_v54 = vadd.f32 %v940_v33, %v900_v19  ;;  %v1134_v55 = vsel %vm522_vm1, %v1132_v20, %v1133_v30  ;;  %v1380_v59 = vrot.slane %v1268_v36, 4  ;;  %v1508_v4 = vmul.f32 %v3861_v11, %v3896_v50 }
  0xbe   : > { %v973_v6 = vadd.f32 %v941_v61, %v901_v32  ;;  %v1136_v8 = vsel %vm522_vm1, %v1133_v30, %v1135_v23  ;;  %v1381_v2 = vrot.slane %v1269_v52, 4  ;;  %v1383_v9 = vrot.slane %v1270_v53, 4  ;;  %v268_v61 = vld [vmem:[%s3238_s9 + $0x148] sm:$0xf] }
  0xbf   : > { %v1220_v10 = vadd.f32 %v1134_v55, %v972_v54  ;;  %v1509_v58 = vmul.f32 %v3861_v11, %v3900_v49  ;;  %v1588_v17 = vmul.f32 %v3872_v25, %v3896_v50  ;;  %v1589_v3 = vmul.f32 %v3872_v25, %v3900_v49 }
  0xc0   : > { %v1221_v18 = vadd.f32 %v1136_v8, %v973_v6  ;;  %v1382_v34 = vsel %vm771_vm2, %v1380_v59, %v1381_v2  ;;  %v1384_v42 = vsel %vm771_vm2, %v1381_v2, %v1383_v9  ;;  %v1590_v43 = vmul.f32 %v3872_v25, %v3902_v57 }
  0xc1   : > { %v1468_v24 = vadd.f32 %v1382_v34, %v1220_v10  ;;  %v1700_v26 = vrot.slane %v1588_v17, 2  ;;  %v1701_v22 = vrot.slane %v1589_v3, 2  ;;  %v1836_v28 = vmul.f32 %v3886_v39, %v3896_v50 }
  0xc2   : > { %v1469_v29 = vadd.f32 %v1384_v42, %v1221_v18  ;;  %v1703_v33 = vrot.slane %v1590_v43, 2  ;;  %v1837_v35 = vmul.f32 %v3886_v39, %v3900_v49  ;;  %v1838_v63 = vmul.f32 %v3886_v39, %v3902_v57 }
  0xc3   : > { %v1540_v12 = vadd.f32 %v1508_v4, %v1468_v24  ;;  %v1702_v38 = vsel %vm522_vm1, %v1700_v26, %v1701_v22  ;;  %v1948_v13 = vrot.slane %v1836_v28, 4  ;;  %v3967_v31 = vmax.f32 %v266_v16, 0.0 }
  0xc4   : > { %v1541_v40 = vadd.f32 %v1509_v58, %v1469_v29  ;;  %v1704_v44 = vsel %vm522_vm1, %v1701_v22, %v1703_v33  ;;  %v1949_v45 = vrot.slane %v1837_v35, 4  ;;  %v1951_v48 = vrot.slane %v1838_v63, 4 }
  0xc5   : > { %v1788_v19 = vadd.f32 %v1702_v38, %v1540_v12  ;;  %v3970_v20 = vmax.f32 %v267_v62, 0.0  ;;  %v3972_v30 = vmax.f32 %v268_v61, 0.0  ;;  %v372_v36 = vmul.f32 %v3792_v5, %v3642_v51 }
  0xc6   : > { %v1789_v32 = vadd.f32 %v1704_v44, %v1541_v40  ;;  %v1950_v23 = vsel %vm771_vm2, %v1948_v13, %v1949_v45  ;;  %v1952_v52 = vsel %vm771_vm2, %v1949_v45, %v1951_v48  ;;  %v373_v53 = vmul.f32 %v3792_v5, %v3645_v60 }
  0xc7   : > { %v2036_v54 = vadd.f32 %v1950_v23, %v1788_v19  ;;  %v453_v55 = vmul.f32 %v3803_v27, %v3642_v51  ;;  %v454_v59 = vmul.f32 %v3803_v27, %v3645_v60  ;;  %v455_v4 = vmul.f32 %v3803_v27, %v3647_v1 }
  0xc8   : > { %v2037_v6 = vadd.f32 %v1952_v52, %v1789_v32  ;;  %v702_v8 = vmul.f32 %v3814_v37, %v3642_v51  ;;  %v703_v2 = vmul.f32 %v3814_v37, %v3645_v60  ;;  %v704_v9 = vmul.f32 %v3814_v37, %v3647_v1 }
  0xc9   : > { %v568_v10 = vrot.slane %v453_v55, 2  ;;  %v569_v58 = vrot.slane %v454_v59, 2  ;;  %v571_v17 = vrot.slane %v455_v4, 2  ;;  %v942_v3 = vmul.f32 %v3825_v41, %v3782_v14 }
  0xca   : > { %v2060_v18 = vpack.c.bf16 %v2037_v6, %v2036_v54  ;;  %v817_v34 = vrot.slane %v702_v8, 4  ;;  %v818_v42 = vrot.slane %v703_v2, 4  ;;  %v820_v43 = vrot.slane %v704_v9, 4  ;;  %v269_v8 = vld [vmem:[%s3238_s9 + $0x150] sm:$0xff] }
  0xcb   : > { %v570_v16 = vsel %vm522_vm1, %v568_v10, %v569_v58  ;;  %v572_v51 = vsel %vm522_vm1, %v569_v58, %v571_v17  ;;  %v943_v60 = vmul.f32 %v3825_v41, %v3785_v15  ;;  %v1023_v1 = vmul.f32 %v3836_v21, %v3782_v14 }
  0xcc   : > { %2937 = vmatprep.mubr.msk.bf16.mxu1 %vm2069_vm3, %v2060_v18  ;;  %v653_v24 = vadd.f32 %v570_v16, %v372_v36  ;;  %v654_v26 = vadd.f32 %v572_v51, %v373_v53  ;;  %v819_v22 = vsel %vm771_vm2, %v817_v34, %v818_v42  ;;  %v821_v28 = vsel %vm771_vm2, %v818_v42, %v820_v43  ;;  %v270_v42 = vld [vmem:[%s3238_s9 + $0x158] sm:$0xff]  ;;  %v271_v43 = vld [vmem:[%s3238_s9 + $0x160] sm:$0xf] }
  0xcd   : > { %v1024_v29 = vmul.f32 %v3836_v21, %v3785_v15  ;;  %v1025_v33 = vmul.f32 %v3836_v21, %v3787_v7  ;;  %v1137_v35 = vrot.slane %v1023_v1, 2  ;;  %v1271_v63 = vmul.f32 %v3850_v56, %v3782_v14 }
  0xce   : > { %v902_v62 = vadd.f32 %v819_v22, %v653_v24  ;;  %v903_v61 = vadd.f32 %v821_v28, %v654_v26  ;;  %v1272_v12 = vmul.f32 %v3850_v56, %v3785_v15  ;;  %v1273_v38 = vmul.f32 %v3850_v56, %v3787_v7 }
  0xcf   : > { %v1138_v13 = vrot.slane %v1024_v29, 2  ;;  %v1140_v40 = vrot.slane %v1025_v33, 2  ;;  %v1385_v44 = vrot.slane %v1271_v63, 4  ;;  %v1510_v45 = vmul.f32 %v3861_v11, %v3967_v31 }
  0xd0   : > { %v974_v48 = vadd.f32 %v942_v3, %v902_v62  ;;  %v975_v19 = vadd.f32 %v943_v60, %v903_v61  ;;  %v1386_v36 = vrot.slane %v1272_v12, 4  ;;  %v1388_v32 = vrot.slane %v1273_v38, 4 }
  0xd1   : > { %v1139_v23 = vsel %vm522_vm1, %v1137_v35, %v1138_v13  ;;  %v1141_v52 = vsel %vm522_vm1, %v1138_v13, %v1140_v40  ;;  %v1511_v53 = vmul.f32 %v3861_v11, %v3970_v20  ;;  %v1591_v54 = vmul.f32 %v3872_v25, %v3967_v31 }
  0xd2   : > { %v1222_v55 = vadd.f32 %v1139_v23, %v974_v48  ;;  %v1223_v59 = vadd.f32 %v1141_v52, %v975_v19  ;;  %v1387_v4 = vsel %vm771_vm2, %v1385_v44, %v1386_v36  ;;  %v1389_v6 = vsel %vm771_vm2, %v1386_v36, %v1388_v32 }
  0xd3   : > { %v1592_v2 = vmul.f32 %v3872_v25, %v3970_v20  ;;  %v1593_v9 = vmul.f32 %v3872_v25, %v3972_v30  ;;  %v1705_v10 = vrot.slane %v1591_v54, 2  ;;  %v1839_v58 = vmul.f32 %v3886_v39, %v3967_v31 }
  0xd4   : > { %v1470_v17 = vadd.f32 %v1387_v4, %v1222_v55  ;;  %v1471_v3 = vadd.f32 %v1389_v6, %v1223_v59  ;;  %v1840_v18 = vmul.f32 %v3886_v39, %v3970_v20  ;;  %v1841_v34 = vmul.f32 %v3886_v39, %v3972_v30 }
  0xd5   : > { %v1706_v16 = vrot.slane %v1592_v2, 2  ;;  %v1708_v51 = vrot.slane %v1593_v9, 2  ;;  %v1953_v60 = vrot.slane %v1839_v58, 4  ;;  %v4036_v1 = vmax.f32 %v269_v8, 0.0 }
  0xd6   : > { %v1542_v24 = vadd.f32 %v1510_v45, %v1470_v17  ;;  %v1543_v26 = vadd.f32 %v1511_v53, %v1471_v3  ;;  %v1954_v22 = vrot.slane %v1840_v18, 4  ;;  %v1956_v28 = vrot.slane %v1841_v34, 4 }
  0xd7   : > { %v1707_v29 = vsel %vm522_vm1, %v1705_v10, %v1706_v16  ;;  %v1709_v33 = vsel %vm522_vm1, %v1706_v16, %v1708_v51  ;;  %v4040_v35 = vmax.f32 %v270_v42, 0.0  ;;  %v4042_v63 = vmax.f32 %v271_v43, 0.0 }
  0xd8   : > { %v1790_v62 = vadd.f32 %v1707_v29, %v1542_v24  ;;  %v1791_v61 = vadd.f32 %v1709_v33, %v1543_v26  ;;  %v1955_v12 = vsel %vm771_vm2, %v1953_v60, %v1954_v22  ;;  %v1957_v38 = vsel %vm771_vm2, %v1954_v22, %v1956_v28 }
  0xd9   : > { %v374_v13 = vmul.f32 %v3792_v5, %v3711_v0  ;;  %v375_v40 = vmul.f32 %v3792_v5, %v3715_v46  ;;  %v456_v44 = vmul.f32 %v3803_v27, %v3711_v0  ;;  %v457_v45 = vmul.f32 %v3803_v27, %v3715_v46 }
  0xda   : > { %v2038_v48 = vadd.f32 %v1955_v12, %v1790_v62  ;;  %v2039_v19 = vadd.f32 %v1957_v38, %v1791_v61  ;;  %v458_v36 = vmul.f32 %v3803_v27, %v3717_v47  ;;  %v705_v32 = vmul.f32 %v3814_v37, %v3711_v0 }
  0xdb   : > { %v573_v23 = vrot.slane %v456_v44, 2  ;;  %v574_v52 = vrot.slane %v457_v45, 2  ;;  %v706_v53 = vmul.f32 %v3814_v37, %v3715_v46  ;;  %v707_v54 = vmul.f32 %v3814_v37, %v3717_v47 }
  0xdc   : > { %v2061_v55 = vpack.c.bf16 %v2039_v19, %v2038_v48  ;;  %v576_v59 = vrot.slane %v458_v36, 2  ;;  %v822_v4 = vrot.slane %v705_v32, 4  ;;  %v944_v6 = vmul.f32 %v3825_v41, %v3896_v50 }
  0xdd   : > { %v575_v8 = vsel %vm522_vm1, %v573_v23, %v574_v52  ;;  %v823_v2 = vrot.slane %v706_v53, 4  ;;  %v825_v9 = vrot.slane %v707_v54, 4  ;;  %v945_v0 = vmul.f32 %v3825_v41, %v3900_v49 }
  0xde   : > { %2938 = vmatmul.mubr.msk.bf16.vlgmr.msra.gmra.mxu1 %vm2069_vm3, %v2061_v55  ;;  %v577_v46 = vsel %vm522_vm1, %v574_v52, %v576_v59  ;;  %v655_v10 = vadd.f32 %v575_v8, %v374_v13  ;;  %v1026_v47 = vmul.f32 %v3836_v21, %v3896_v50  ;;  %v1027_v58 = vmul.f32 %v3836_v21, %v3900_v49  ;;  %v272_v52 = vld [vmem:[%s3238_s9 + $0x168] sm:$0xff] }
  0xdf   : > { %v656_v17 = vadd.f32 %v577_v46, %v375_v40  ;;  %v824_v3 = vsel %vm771_vm2, %v822_v4, %v823_v2  ;;  %v826_v18 = vsel %vm771_vm2, %v823_v2, %v825_v9  ;;  %v1028_v34 = vmul.f32 %v3836_v21, %v3902_v57  ;;  %v273_v9 = vld [vmem:[%s3238_s9 + $0x170] sm:$0xff] }
  0xe0   : > { %v904_v42 = vadd.f32 %v824_v3, %v655_v10  ;;  %v1142_v43 = vrot.slane %v1026_v47, 2  ;;  %v1143_v16 = vrot.slane %v1027_v58, 2  ;;  %v1274_v51 = vmul.f32 %v3850_v56, %v3896_v50 }
  0xe1   : > { %v905_v60 = vadd.f32 %v826_v18, %v656_v17  ;;  %v1145_v24 = vrot.slane %v1028_v34, 2  ;;  %v1275_v26 = vmul.f32 %v3850_v56, %v3900_v49  ;;  %v1276_v22 = vmul.f32 %v3850_v56, %v3902_v57 }
  0xe2   : > { %v976_v28 = vadd.f32 %v944_v6, %v904_v42  ;;  %v1144_v29 = vsel %vm522_vm1, %v1142_v43, %v1143_v16  ;;  %v1390_v33 = vrot.slane %v1274_v51, 4  ;;  %v1512_v62 = vmul.f32 %v3861_v11, %v4036_v1 }
  0xe3   : > { %v977_v61 = vadd.f32 %v945_v0, %v905_v60  ;;  %v1146_v12 = vsel %vm522_vm1, %v1143_v16, %v1145_v24  ;;  %v1391_v38 = vrot.slane %v1275_v26, 4  ;;  %v1393_v13 = vrot.slane %v1276_v22, 4  ;;  %v274_v0 = vld [vmem:[%s3238_s9 + $0x178] sm:$0xf] }
  0xe4   : > { %v1224_v40 = vadd.f32 %v1144_v29, %v976_v28  ;;  %v1513_v44 = vmul.f32 %v3861_v11, %v4040_v35  ;;  %v1594_v45 = vmul.f32 %v3872_v25, %v4036_v1  ;;  %v1595_v48 = vmul.f32 %v3872_v25, %v4040_v35 }
  0xe5   : > { %v1225_v19 = vadd.f32 %v1146_v12, %v977_v61  ;;  %v1392_v36 = vsel %vm771_vm2, %v1390_v33, %v1391_v38  ;;  %v1394_v32 = vsel %vm771_vm2, %v1391_v38, %v1393_v13  ;;  %v1596_v23 = vmul.f32 %v3872_v25, %v4042_v63 }
  0xe6   : > { %v1472_v53 = vadd.f32 %v1392_v36, %v1224_v40  ;;  %v1710_v54 = vrot.slane %v1594_v45, 2  ;;  %v1711_v55 = vrot.slane %v1595_v48, 2  ;;  %v1842_v59 = vmul.f32 %v3886_v39, %v4036_v1 }
  0xe7   : > { %v1473_v4 = vadd.f32 %v1394_v32, %v1225_v19  ;;  %v1713_v6 = vrot.slane %v1596_v23, 2  ;;  %v1843_v8 = vmul.f32 %v3886_v39, %v4040_v35  ;;  %v1844_v2 = vmul.f32 %v3886_v39, %v4042_v63 }
  0xe8   : > { %v1544_v46 = vadd.f32 %v1512_v62, %v1472_v53  ;;  %v1712_v10 = vsel %vm522_vm1, %v1710_v54, %v1711_v55  ;;  %v1958_v47 = vrot.slane %v1842_v59, 4  ;;  %v4107_v58 = vmax.f32 %v272_v52, 0.0 }
  0xe9   : > { %v1545_v17 = vadd.f32 %v1513_v44, %v1473_v4  ;;  %v1714_v3 = vsel %vm522_vm1, %v1711_v55, %v1713_v6  ;;  %v1959_v18 = vrot.slane %v1843_v8, 4  ;;  %v1961_v34 = vrot.slane %v1844_v2, 4 }
  0xea   : > { %v1792_v42 = vadd.f32 %v1712_v10, %v1544_v46  ;;  %v4110_v43 = vmax.f32 %v273_v9, 0.0  ;;  %v4112_v16 = vmax.f32 %v274_v0, 0.0  ;;  %v376_v51 = vmul.f32 %v3792_v5, %v3782_v14 }
  0xeb   : > { %v1793_v60 = vadd.f32 %v1714_v3, %v1545_v17  ;;  %v1960_v24 = vsel %vm771_vm2, %v1958_v47, %v1959_v18  ;;  %v1962_v26 = vsel %vm771_vm2, %v1959_v18, %v1961_v34  ;;  %v377_v22 = vmul.f32 %v3792_v5, %v3785_v15 }
  0xec   : > { %v2040_v28 = vadd.f32 %v1960_v24, %v1792_v42  ;;  %v459_v29 = vmul.f32 %v3803_v27, %v3782_v14  ;;  %v460_v33 = vmul.f32 %v3803_v27, %v3785_v15  ;;  %v461_v62 = vmul.f32 %v3803_v27, %v3787_v7 }
  0xed   : > { %v2041_v61 = vadd.f32 %v1962_v26, %v1793_v60  ;;  %v708_v12 = vmul.f32 %v3814_v37, %v3782_v14  ;;  %v709_v38 = vmul.f32 %v3814_v37, %v3785_v15  ;;  %v710_v13 = vmul.f32 %v3814_v37, %v3787_v7 }
  0xee   : > { %v578_v40 = vrot.slane %v459_v29, 2  ;;  %v579_v44 = vrot.slane %v460_v33, 2  ;;  %v581_v45 = vrot.slane %v461_v62, 2  ;;  %v946_v48 = vmul.f32 %v3825_v41, %v3967_v31 }
  0xef   : > { %v2062_v19 = vpack.c.bf16 %v2041_v61, %v2040_v28  ;;  %v827_v36 = vrot.slane %v708_v12, 4  ;;  %v828_v32 = vrot.slane %v709_v38, 4  ;;  %v830_v23 = vrot.slane %v710_v13, 4  ;;  %v275_v12 = vld [vmem:[%s3238_s9 + $0x180] sm:$0xff] }
  0xf0   : > { %v580_v52 = vsel %vm522_vm1, %v578_v40, %v579_v44  ;;  %v582_v14 = vsel %vm522_vm1, %v579_v44, %v581_v45  ;;  %v947_v15 = vmul.f32 %v3825_v41, %v3970_v20  ;;  %v1029_v7 = vmul.f32 %v3836_v21, %v3967_v31 }
  0xf1   : > { %2941 = vmatprep.mubr.msk.bf16.mxu1 %vm2069_vm3, %v2062_v19  ;;  %v657_v53 = vadd.f32 %v580_v52, %v376_v51  ;;  %v658_v54 = vadd.f32 %v582_v14, %v377_v22  ;;  %v829_v55 = vsel %vm771_vm2, %v827_v36, %v828_v32  ;;  %v831_v59 = vsel %vm771_vm2, %v828_v32, %v830_v23  ;;  %v276_v32 = vld [vmem:[%s3238_s9 + $0x188] sm:$0xff]  ;;  %v277_v23 = vld [vmem:[%s3238_s9 + $0x190] sm:$0xf] }
  0xf2   : > { %v1030_v4 = vmul.f32 %v3836_v21, %v3970_v20  ;;  %v1031_v6 = vmul.f32 %v3836_v21, %v3972_v30  ;;  %v1147_v8 = vrot.slane %v1029_v7, 2  ;;  %v1277_v2 = vmul.f32 %v3850_v56, %v3967_v31 }
  0xf3   : > { %v906_v9 = vadd.f32 %v829_v55, %v657_v53  ;;  %v907_v0 = vadd.f32 %v831_v59, %v658_v54  ;;  %v1278_v46 = vmul.f32 %v3850_v56, %v3970_v20  ;;  %v1279_v10 = vmul.f32 %v3850_v56, %v3972_v30 }
  0xf4   : > { %v1148_v47 = vrot.slane %v1030_v4, 2  ;;  %v1150_v17 = vrot.slane %v1031_v6, 2  ;;  %v1395_v3 = vrot.slane %v1277_v2, 4  ;;  %v1514_v18 = vmul.f32 %v3861_v11, %v4107_v58 }
  0xf5   : > { %v978_v34 = vadd.f32 %v946_v48, %v906_v9  ;;  %v979_v42 = vadd.f32 %v947_v15, %v907_v0  ;;  %v1396_v51 = vrot.slane %v1278_v46, 4  ;;  %v1398_v60 = vrot.slane %v1279_v10, 4 }
  0xf6   : > { %v1149_v24 = vsel %vm522_vm1, %v1147_v8, %v1148_v47  ;;  %v1151_v26 = vsel %vm522_vm1, %v1148_v47, %v1150_v17  ;;  %v1515_v22 = vmul.f32 %v3861_v11, %v4110_v43  ;;  %v1597_v28 = vmul.f32 %v3872_v25, %v4107_v58 }
  0xf7   : > { %v1226_v29 = vadd.f32 %v1149_v24, %v978_v34  ;;  %v1227_v33 = vadd.f32 %v1151_v26, %v979_v42  ;;  %v1397_v62 = vsel %vm771_vm2, %v1395_v3, %v1396_v51  ;;  %v1399_v61 = vsel %vm771_vm2, %v1396_v51, %v1398_v60 }
  0xf8   : > { %v1598_v38 = vmul.f32 %v3872_v25, %v4110_v43  ;;  %v1599_v13 = vmul.f32 %v3872_v25, %v4112_v16  ;;  %v1715_v40 = vrot.slane %v1597_v28, 2  ;;  %v1845_v44 = vmul.f32 %v3886_v39, %v4107_v58 }
  0xf9   : > { %v1474_v45 = vadd.f32 %v1397_v62, %v1226_v29  ;;  %v1475_v48 = vadd.f32 %v1399_v61, %v1227_v33  ;;  %v1846_v19 = vmul.f32 %v3886_v39, %v4110_v43  ;;  %v1847_v36 = vmul.f32 %v3886_v39, %v4112_v16 }
  0xfa   : > { %v1716_v52 = vrot.slane %v1598_v38, 2  ;;  %v1718_v14 = vrot.slane %v1599_v13, 2  ;;  %v1963_v15 = vrot.slane %v1845_v44, 4  ;;  %v4176_v7 = vmax.f32 %v275_v12, 0.0 }
  0xfb   : > { %v1546_v53 = vadd.f32 %v1514_v18, %v1474_v45  ;;  %v1547_v54 = vadd.f32 %v1515_v22, %v1475_v48  ;;  %v1964_v55 = vrot.slane %v1846_v19, 4  ;;  %v1966_v59 = vrot.slane %v1847_v36, 4 }
  0xfc   : > { %v1717_v4 = vsel %vm522_vm1, %v1715_v40, %v1716_v52  ;;  %v1719_v6 = vsel %vm522_vm1, %v1716_v52, %v1718_v14  ;;  %v4180_v8 = vmax.f32 %v276_v32, 0.0  ;;  %v4182_v2 = vmax.f32 %v277_v23, 0.0 }
  0xfd   : > { %v1794_v9 = vadd.f32 %v1717_v4, %v1546_v53  ;;  %v1795_v0 = vadd.f32 %v1719_v6, %v1547_v54  ;;  %v1965_v46 = vsel %vm771_vm2, %v1963_v15, %v1964_v55  ;;  %v1967_v10 = vsel %vm771_vm2, %v1964_v55, %v1966_v59 }
  0xfe   : > { %v378_v47 = vmul.f32 %v3792_v5, %v3896_v50  ;;  %v379_v17 = vmul.f32 %v3792_v5, %v3900_v49  ;;  %v462_v3 = vmul.f32 %v3803_v27, %v3896_v50  ;;  %v463_v18 = vmul.f32 %v3803_v27, %v3900_v49 }
  0xff   : > { %v2042_v34 = vadd.f32 %v1965_v46, %v1794_v9  ;;  %v2043_v42 = vadd.f32 %v1967_v10, %v1795_v0  ;;  %v464_v51 = vmul.f32 %v3803_v27, %v3902_v57  ;;  %v711_v60 = vmul.f32 %v3814_v37, %v3896_v50 }
 0x100   : > { %v583_v24 = vrot.slane %v462_v3, 2  ;;  %v584_v26 = vrot.slane %v463_v18, 2  ;;  %v712_v22 = vmul.f32 %v3814_v37, %v3900_v49  ;;  %v713_v28 = vmul.f32 %v3814_v37, %v3902_v57 }
 0x101   : > { %v2063_v29 = vpack.c.bf16 %v2043_v42, %v2042_v34  ;;  %v586_v33 = vrot.slane %v464_v51, 2  ;;  %v832_v62 = vrot.slane %v711_v60, 4  ;;  %v948_v61 = vmul.f32 %v3825_v41, %v4036_v1 }
 0x102   : > { %v585_v12 = vsel %vm522_vm1, %v583_v24, %v584_v26  ;;  %v833_v38 = vrot.slane %v712_v22, 4  ;;  %v835_v13 = vrot.slane %v713_v28, 4  ;;  %v949_v50 = vmul.f32 %v3825_v41, %v4040_v35 }
 0x103   : > { %2942 = vmatmul.mubr.msk.bf16.gmra.mxu1 %vm2069_vm3, %v2063_v29  ;;  %v587_v49 = vsel %vm522_vm1, %v584_v26, %v586_v33  ;;  %v659_v40 = vadd.f32 %v585_v12, %v378_v47  ;;  %v1032_v57 = vmul.f32 %v3836_v21, %v4036_v1  ;;  %v1033_v44 = vmul.f32 %v3836_v21, %v4040_v35  ;;  %v278_v26 = vld [vmem:[%s3238_s9 + $0x198] sm:$0xff] }
 0x104   : > { %v660_v45 = vadd.f32 %v587_v49, %v379_v17  ;;  %v834_v48 = vsel %vm771_vm2, %v832_v62, %v833_v38  ;;  %v836_v19 = vsel %vm771_vm2, %v833_v38, %v835_v13  ;;  %v1034_v36 = vmul.f32 %v3836_v21, %v4042_v63  ;;  %v279_v13 = vld [vmem:[%s3238_s9 + $0x1a0] sm:$0xff] }
 0x105   : > { %v908_v32 = vadd.f32 %v834_v48, %v659_v40  ;;  %v1152_v23 = vrot.slane %v1032_v57, 2  ;;  %v1153_v52 = vrot.slane %v1033_v44, 2  ;;  %v1280_v14 = vmul.f32 %v3850_v56, %v4036_v1 }
 0x106   : > { %v909_v15 = vadd.f32 %v836_v19, %v660_v45  ;;  %v1155_v53 = vrot.slane %v1034_v36, 2  ;;  %v1281_v54 = vmul.f32 %v3850_v56, %v4040_v35  ;;  %v1282_v55 = vmul.f32 %v3850_v56, %v4042_v63 }
 0x107   : > { %v980_v59 = vadd.f32 %v948_v61, %v908_v32  ;;  %v1154_v4 = vsel %vm522_vm1, %v1152_v23, %v1153_v52  ;;  %v1400_v6 = vrot.slane %v1280_v14, 4  ;;  %v1516_v9 = vmul.f32 %v3861_v11, %v4176_v7 }
 0x108   : > { %v981_v0 = vadd.f32 %v949_v50, %v909_v15  ;;  %v1156_v46 = vsel %vm522_vm1, %v1153_v52, %v1155_v53  ;;  %v1401_v10 = vrot.slane %v1281_v54, 4  ;;  %v1403_v47 = vrot.slane %v1282_v55, 4  ;;  %v280_v50 = vld [vmem:[%s3238_s9 + $0x1a8] sm:$0xf] }
 0x109   : > { %v1228_v17 = vadd.f32 %v1154_v4, %v980_v59  ;;  %v1517_v3 = vmul.f32 %v3861_v11, %v4180_v8  ;;  %v1600_v18 = vmul.f32 %v3872_v25, %v4176_v7  ;;  %v1601_v34 = vmul.f32 %v3872_v25, %v4180_v8 }
 0x10a   : > { %v1229_v42 = vadd.f32 %v1156_v46, %v981_v0  ;;  %v1402_v51 = vsel %vm771_vm2, %v1400_v6, %v1401_v10  ;;  %v1404_v60 = vsel %vm771_vm2, %v1401_v10, %v1403_v47  ;;  %v1602_v24 = vmul.f32 %v3872_v25, %v4182_v2 }
 0x10b   : > { %v1476_v22 = vadd.f32 %v1402_v51, %v1228_v17  ;;  %v1720_v28 = vrot.slane %v1600_v18, 2  ;;  %v1721_v29 = vrot.slane %v1601_v34, 2  ;;  %v1848_v33 = vmul.f32 %v3886_v39, %v4176_v7 }
 0x10c   : > { %v1477_v62 = vadd.f32 %v1404_v60, %v1229_v42  ;;  %v1723_v61 = vrot.slane %v1602_v24, 2  ;;  %v1849_v12 = vmul.f32 %v3886_v39, %v4180_v8  ;;  %v1850_v38 = vmul.f32 %v3886_v39, %v4182_v2 }
 0x10d   : > { %v1548_v49 = vadd.f32 %v1516_v9, %v1476_v22  ;;  %v1722_v40 = vsel %vm522_vm1, %v1720_v28, %v1721_v29  ;;  %v1968_v57 = vrot.slane %v1848_v33, 4  ;;  %v4247_v44 = vmax.f32 %v278_v26, 0.0 }
 0x10e   : > { %v1549_v45 = vadd.f32 %v1517_v3, %v1477_v62  ;;  %v1724_v48 = vsel %vm522_vm1, %v1721_v29, %v1723_v61  ;;  %v1969_v19 = vrot.slane %v1849_v12, 4  ;;  %v1971_v36 = vrot.slane %v1850_v38, 4 }
 0x10f   : > { %v1796_v32 = vadd.f32 %v1722_v40, %v1548_v49  ;;  %v4250_v23 = vmax.f32 %v279_v13, 0.0  ;;  %v4252_v52 = vmax.f32 %v280_v50, 0.0  ;;  %v380_v14 = vmul.f32 %v3792_v5, %v3967_v31 }
 0x110   : > { %v1797_v15 = vadd.f32 %v1724_v48, %v1549_v45  ;;  %v1970_v53 = vsel %vm771_vm2, %v1968_v57, %v1969_v19  ;;  %v1972_v54 = vsel %vm771_vm2, %v1969_v19, %v1971_v36  ;;  %v381_v55 = vmul.f32 %v3792_v5, %v3970_v20 }
 0x111   : > { %v2044_v59 = vadd.f32 %v1970_v53, %v1796_v32  ;;  %v465_v4 = vmul.f32 %v3803_v27, %v3967_v31  ;;  %v466_v6 = vmul.f32 %v3803_v27, %v3970_v20  ;;  %v467_v9 = vmul.f32 %v3803_v27, %v3972_v30 }
 0x112   : > { %v2045_v0 = vadd.f32 %v1972_v54, %v1797_v15  ;;  %v714_v46 = vmul.f32 %v3814_v37, %v3967_v31  ;;  %v715_v10 = vmul.f32 %v3814_v37, %v3970_v20  ;;  %v716_v5 = vmul.f32 %v3814_v37, %v3972_v30 }
 0x113   : > { %v588_v47 = vrot.slane %v465_v4, 2  ;;  %v589_v17 = vrot.slane %v466_v6, 2  ;;  %v591_v3 = vrot.slane %v467_v9, 2  ;;  %v950_v18 = vmul.f32 %v3825_v41, %v4107_v58 }
 0x114   : > { %v2064_v34 = vpack.c.bf16 %v2045_v0, %v2044_v59  ;;  %v837_v42 = vrot.slane %v714_v46, 4  ;;  %v838_v51 = vrot.slane %v715_v10, 4  ;;  %v840_v27 = vrot.slane %v716_v5, 4  ;;  %v282_v5 = vld [vmem:[%s3238_s9 + $0x1b8] sm:$0xff] }
 0x115   : > { %v590_v60 = vsel %vm522_vm1, %v588_v47, %v589_v17  ;;  %v592_v31 = vsel %vm522_vm1, %v589_v17, %v591_v3  ;;  %v951_v20 = vmul.f32 %v3825_v41, %v4110_v43  ;;  %v1035_v37 = vmul.f32 %v3836_v21, %v4107_v58  ;;  %v4316_v47 = vld [vmem:[%s3238_s9 + $0x1c0] sm:$0xf] }
 0x116   : > { %2945 = vmatprep.mubr.msk.bf16.mxu1 %vm2069_vm3, %v2064_v34  ;;  %v661_v30 = vadd.f32 %v590_v60, %v380_v14  ;;  %v662_v24 = vadd.f32 %v592_v31, %v381_v55  ;;  %v839_v26 = vsel %vm771_vm2, %v837_v42, %v838_v51  ;;  %v841_v22 = vsel %vm771_vm2, %v838_v51, %v840_v27  ;;  %v281_v55 = vld [vmem:[%s3238_s9 + $0x1b0] sm:$0xff] }
 0x117   : > { %v1036_v28 = vmul.f32 %v3836_v21, %v4110_v43  ;;  %v1037_v29 = vmul.f32 %v3836_v21, %v4112_v16  ;;  %v1157_v33 = vrot.slane %v1035_v37, 2  ;;  %v1283_v41 = vmul.f32 %v3850_v56, %v4107_v58 }
 0x118   : > { %v910_v62 = vadd.f32 %v839_v26, %v661_v30  ;;  %v911_v61 = vadd.f32 %v841_v22, %v662_v24  ;;  %v1284_v12 = vmul.f32 %v3850_v56, %v4110_v43  ;;  %v1285_v38 = vmul.f32 %v3850_v56, %v4112_v16  ;;  %v4330_v22 = vld [vmem:[%s4634_s1] ss:$0 sm:$0xff] }
 0x119   : > { %v1158_v13 = vrot.slane %v1036_v28, 2  ;;  %v1160_v50 = vrot.slane %v1037_v29, 2  ;;  %v1405_v49 = vrot.slane %v1283_v41, 4  ;;  %v1518_v40 = vmul.f32 %v3861_v11, %v4247_v44 }
 0x11a   : > { %v982_v21 = vadd.f32 %v950_v18, %v910_v62  ;;  %v983_v57 = vadd.f32 %v951_v20, %v911_v61  ;;  %v1406_v45 = vrot.slane %v1284_v12, 4  ;;  %v1408_v48 = vrot.slane %v1285_v38, 4 }
 0x11b   : > { %v1159_v19 = vsel %vm522_vm1, %v1157_v33, %v1158_v13  ;;  %v1161_v36 = vsel %vm522_vm1, %v1158_v13, %v1160_v50  ;;  %v1519_v32 = vmul.f32 %v3861_v11, %v4250_v23  ;;  %v1603_v56 = vmul.f32 %v3872_v25, %v4247_v44  ;;  %v4339_v33 = vld [vmem:[%s4634_s1 + $0x1] ss:$0 sm:$0xff]  ;;  %v4350_v13 = vld [vmem:[%s4634_s1 + $0x2] ss:$0 sm:$0xff] }
 0x11c   : > { %v1230_v14 = vadd.f32 %v1159_v19, %v982_v21  ;;  %v1231_v15 = vadd.f32 %v1161_v36, %v983_v57  ;;  %v1407_v53 = vsel %vm771_vm2, %v1405_v49, %v1406_v45  ;;  %v1409_v54 = vsel %vm771_vm2, %v1406_v45, %v1408_v48  ;;  %v4361_v36 = vld [vmem:[%s4634_s1 + $0x3] ss:$0 sm:$0xff] }
 0x11d   : > { %v1604_v59 = vmul.f32 %v3872_v25, %v4250_v23  ;;  %v1605_v4 = vmul.f32 %v3872_v25, %v4252_v52  ;;  %v1725_v6 = vrot.slane %v1603_v56, 2  ;;  %v1851_v11 = vmul.f32 %v3886_v39, %v4247_v44 }
 0x11e   : > { %v1478_v9 = vadd.f32 %v1407_v53, %v1230_v14  ;;  %v1479_v0 = vadd.f32 %v1409_v54, %v1231_v15  ;;  %v1852_v46 = vmul.f32 %v3886_v39, %v4250_v23  ;;  %v1853_v10 = vmul.f32 %v3886_v39, %v4252_v52  ;;  %v4373_v53 = vld [vmem:[%s4634_s1 + $0x4] ss:$0 sm:$0xff] }
 0x11f   : > { %v1726_v17 = vrot.slane %v1604_v59, 2  ;;  %v1728_v3 = vrot.slane %v1605_v4, 2  ;;  %v1973_v18 = vrot.slane %v1851_v11, 4  ;;  %v4318_v34 = vmax.f32 %v281_v55, 0.0 }
 0x120   : > { %v1550_v25 = vadd.f32 %v1518_v40, %v1478_v9  ;;  %v1551_v42 = vadd.f32 %v1519_v32, %v1479_v0  ;;  %v1974_v51 = vrot.slane %v1852_v46, 4  ;;  %v1976_v27 = vrot.slane %v1853_v10, 4  ;;  %v4386_v10 = vld [vmem:[%s4634_s1 + $0x5] ss:$0 sm:$0xff] }
 0x121   : > { %v1727_v60 = vsel %vm522_vm1, %v1725_v6, %v1726_v17  ;;  %v1729_v31 = vsel %vm522_vm1, %v1726_v17, %v1728_v3  ;;  %v4322_v20 = vmax.f32 %v282_v5, 0.0  ;;  %v343_v39 = vmax.f32 %v4316_v47, 0.0 }
 0x122   : > { %v1798_v37 = vadd.f32 %v1727_v60, %v1550_v25  ;;  %v1799_v30 = vadd.f32 %v1729_v31, %v1551_v42  ;;  %v1975_v24 = vsel %vm771_vm2, %v1973_v18, %v1974_v51  ;;  %v1977_v26 = vsel %vm771_vm2, %v1974_v51, %v1976_v27  ;;  %v4398_v60 = vld [vmem:[%s4634_s1 + $0x6] ss:$0 sm:$0xff]  ;;  %v4402_v31 = vpop.f32.mrf.mxu0 }
 0x123   : > { %v382_v28 = vmul.f32 %v4330_v22, %v4036_v1  ;;  %v383_v29 = vmul.f32 %v4330_v22, %v4040_v35  ;;  %v468_v41 = vmul.f32 %v4339_v33, %v4036_v1  ;;  %v469_v62 = vmul.f32 %v4339_v33, %v4040_v35 }
 0x124   : > { %v2046_v61 = vadd.f32 %v1975_v24, %v1798_v37  ;;  %v2047_v12 = vadd.f32 %v1977_v26, %v1799_v30  ;;  %v470_v38 = vmul.f32 %v4339_v33, %v4042_v63  ;;  %v717_v50 = vmul.f32 %v4350_v13, %v4036_v1 }
 0x125   : > { %v593_v49 = vrot.slane %v468_v41, 2  ;;  %v594_v40 = vrot.slane %v469_v62, 2  ;;  %v718_v21 = vmul.f32 %v4350_v13, %v4040_v35  ;;  %v719_v57 = vmul.f32 %v4350_v13, %v4042_v63 }
 0x126   : > { %v2065_v45 = vpack.c.bf16 %v2047_v12, %v2046_v61  ;;  %v596_v48 = vrot.slane %v470_v38, 2  ;;  %v842_v19 = vrot.slane %v717_v50, 4  ;;  %v952_v32 = vmul.f32 %v4361_v36, %v4176_v7  ;;  %v284_v50 = vld [vmem:[%s3238_s9 + $0x1c8] sm:$0xff] }
 0x127   : > { %v595_v1 = vsel %vm522_vm1, %v593_v49, %v594_v40  ;;  %v843_v56 = vrot.slane %v718_v21, 4  ;;  %v845_v14 = vrot.slane %v719_v57, 4  ;;  %v953_v35 = vmul.f32 %v4361_v36, %v4180_v8  ;;  %v4425_v57 = vld [vmem:[%s4634_s1 + $0x8] ss:$0 sm:$0xff] }
 0x128   : > { %2946 = vmatmul.mubr.msk.bf16.gmra.mxu1 %vm2069_vm3, %v2065_v45  ;;  %v597_v63 = vsel %vm522_vm1, %v594_v40, %v596_v48  ;;  %v663_v15 = vadd.f32 %v595_v1, %v382_v28  ;;  %v1038_v54 = vmul.f32 %v4373_v53, %v4176_v7  ;;  %v1039_v55 = vmul.f32 %v4373_v53, %v4180_v8  ;;  %v4410_v28 = vld [vmem:[%s4634_s1 + $0x7] ss:$0 sm:$0xff]  ;;  %v4429_v48 = vpop.f32.mrf.mxu0 }
 0x129   : > { %v664_v59 = vadd.f32 %v597_v63, %v383_v29  ;;  %v844_v4 = vsel %vm771_vm2, %v842_v19, %v843_v56  ;;  %v846_v6 = vsel %vm771_vm2, %v843_v56, %v845_v14  ;;  %v1040_v11 = vmul.f32 %v4373_v53, %v4182_v2  ;;  %v285_v14 = vld [vmem:[%s3238_s9 + $0x1d0] sm:$0xff] }
 0x12a   : > { %v912_v9 = vadd.f32 %v844_v4, %v663_v15  ;;  %v1162_v0 = vrot.slane %v1038_v54, 2  ;;  %v1163_v46 = vrot.slane %v1039_v55, 2  ;;  %v1286_v5 = vmul.f32 %v4386_v10, %v4176_v7 }
 0x12b   : > { %v913_v17 = vadd.f32 %v846_v6, %v664_v59  ;;  %v1165_v3 = vrot.slane %v1040_v11, 2  ;;  %v1287_v18 = vmul.f32 %v4386_v10, %v4180_v8  ;;  %v1288_v25 = vmul.f32 %v4386_v10, %v4182_v2 }
 0x12c   : > { %v984_v42 = vadd.f32 %v952_v32, %v912_v9  ;;  %v1164_v51 = vsel %vm522_vm1, %v1162_v0, %v1163_v46  ;;  %v1410_v27 = vrot.slane %v1286_v5, 4  ;;  %v1520_v7 = vmul.f32 %v4398_v60, %v4318_v34  ;;  %v4449_v9 = vpop.f32.mrf.mxu0 }
 0x12d   : > { %v985_v37 = vadd.f32 %v953_v35, %v913_v17  ;;  %v1166_v8 = vsel %vm522_vm1, %v1163_v46, %v1165_v3  ;;  %v1411_v30 = vrot.slane %v1287_v18, 4  ;;  %v1413_v2 = vrot.slane %v1288_v25, 4  ;;  %v4438_v35 = vld [vmem:[%s3238_s9 + $0x1d8] sm:$0xf]  ;;  %s4503_s9 = sand.u32 1, %s3128_s16  }
 0x12e   : > { %v1232_v24 = vadd.f32 %v1164_v51, %v984_v42  ;;  %v1521_v26 = vmul.f32 %v4398_v60, %v4322_v20  ;;  %v1606_v29 = vmul.f32 %v4410_v28, %v4318_v34  ;;  %v1607_v41 = vmul.f32 %v4410_v28, %v4322_v20  ;;  %s2699_s29 = sshll.u32 %s4503_s9, 7  ;;  %s2552_s11 = scalar_lea.sflag [#allocation3], %s4503_s9 }
 0x12f   : > { %v1233_v62 = vadd.f32 %v1166_v8, %v985_v37  ;;  %v1412_v61 = vsel %vm771_vm2, %v1410_v27, %v1411_v30  ;;  %v1414_v12 = vsel %vm771_vm2, %v1411_v30, %v1413_v2  ;;  %v1608_v38 = vmul.f32 %v4410_v28, %v343_v39  ;;  %s4534_s30 = scalar_lea.vmem [#allocation2], %s2699_s29 }
 0x130   : > { %v1480_v49 = vadd.f32 %v1412_v61, %v1232_v24  ;;  %v1730_v40 = vrot.slane %v1606_v29, 2  ;;  %v1731_v21 = vrot.slane %v1607_v41, 2  ;;  %v1854_v45 = vmul.f32 %v4425_v57, %v4318_v34  ;;  %v4469_v24 = vpop.f32.mrf.mxu0  ;;  %s2572_s6 = sshll.u32 %s4534_s30, 4  ;;  %s4566_s6 = int_to_ptr.vmem [resolvable:$true] %s2572_s6 }
 0x131   : > { %v1481_v19 = vadd.f32 %v1414_v12, %v1233_v62  ;;  %v1733_v32 = vrot.slane %v1608_v38, 2  ;;  %v1855_v1 = vmul.f32 %v4425_v57, %v4322_v20  ;;  %v1856_v56 = vmul.f32 %v4425_v57, %v343_v39  ;;  %s3038_s12 = scalar_lea.vmem %s4566_s6, 2048  ;;  %p3045_p1 = scmp.lt.s32.totalorder %s4566_s6, %s3043_s14 }
 0x132   : > { %v1552_v63 = vadd.f32 %v1520_v7, %v1480_v49  ;;  %v1732_v15 = vsel %vm522_vm1, %v1730_v40, %v1731_v21  ;;  %v1978_v54 = vrot.slane %v1854_v45, 4  ;;  %v4441_v55 = vmax.f32 %v284_v50, 0.0  ;;  %p3039_p12 = scmp.ne.s32.totalorder %s4566_s6, %s3038_s12  ;;  %p3046_p2 = scmp.lt.s32.totalorder %s3044_s21, %s3038_s12 }
 0x133   : > { %v1553_v34 = vadd.f32 %v1521_v26, %v1481_v19  ;;  %v1734_v59 = vsel %vm522_vm1, %v1731_v21, %v1733_v32  ;;  %v1979_v4 = vrot.slane %v1855_v1, 4  ;;  %v1981_v6 = vrot.slane %v1856_v56, 4  ;;  %v4486_v21 = vpop.f32.mrf.mxu0 }
 0x134   : > { %v1800_v11 = vadd.f32 %v1732_v15, %v1552_v63  ;;  %v4444_v20 = vmax.f32 %v285_v14, 0.0  ;;  %v346_v47 = vmax.f32 %v4438_v35, 0.0  ;;  %v384_v39 = vmul.f32 %v4330_v22, %v4107_v58  ;;  %p3040_p13 = pnand %p3039_p12, %p3215_p4  ;;  %p3047_p3 = por %p3046_p2, %p3045_p1 }
 0x135   : > { %v1801_v0 = vadd.f32 %v1734_v59, %v1553_v34  ;;  %v1980_v46 = vsel %vm771_vm2, %v1978_v54, %v1979_v4  ;;  %v1982_v5 = vsel %vm771_vm2, %v1979_v4, %v1981_v6  ;;  %v385_v17 = vmul.f32 %v4330_v22, %v4110_v43 }
 0x136   : > { %v2048_v3 = vadd.f32 %v1980_v46, %v1800_v11  ;;  %v471_v18 = vmul.f32 %v4339_v33, %v4107_v58  ;;  %v472_v25 = vmul.f32 %v4339_v33, %v4110_v43  ;;  %v473_v42 = vmul.f32 %v4339_v33, %v4112_v16  ;;  %p3041_p0 = pneg %p3040_p13 }
 0x137   : > { %v2049_v51 = vadd.f32 %v1982_v5, %v1801_v0  ;;  %v720_v27 = vmul.f32 %v4350_v13, %v4107_v58  ;;  %v721_v7 = vmul.f32 %v4350_v13, %v4110_v43  ;;  %v722_v22 = vmul.f32 %v4350_v13, %v4112_v16 }
 0x138   : > { %v598_v37 = vrot.slane %v471_v18, 2  ;;  %v599_v8 = vrot.slane %v472_v25, 2  ;;  %v601_v30 = vrot.slane %v473_v42, 2  ;;  %v954_v2 = vmul.f32 %v4361_v36, %v4247_v44  ;;  %p3048_p5 = pnand %p3047_p3, %p3041_p0 }
 0x139   : > { %v2066_v26 = vpack.c.bf16 %v2049_v51, %v2048_v3  ;;  %v847_v33 = vrot.slane %v720_v27, 4  ;;  %v848_v29 = vrot.slane %v721_v7, 4  ;;  %v850_v41 = vrot.slane %v722_v22, 4 }
 0x13a   : > { %v600_v58 = vsel %vm522_vm1, %v598_v37, %v599_v8  ;;  %v602_v62 = vsel %vm522_vm1, %v599_v8, %v601_v30  ;;  %v955_v43 = vmul.f32 %v4361_v36, %v4250_v23  ;;  %v1041_v16 = vmul.f32 %v4373_v53, %v4247_v44 }
 0x13b   : > { %2949 = vmatprep.mubr.msk.bf16.mxu1 %vm2069_vm3, %v2066_v26  ;;  %v665_v13 = vadd.f32 %v600_v58, %v384_v39  ;;  %v666_v61 = vadd.f32 %v602_v62, %v385_v17  ;;  %v849_v12 = vsel %vm771_vm2, %v847_v33, %v848_v29  ;;  %v851_v38 = vsel %vm771_vm2, %v848_v29, %v850_v41 }
 0x13c   : > { %v1042_v50 = vmul.f32 %v4373_v53, %v4250_v23  ;;  %v1043_v49 = vmul.f32 %v4373_v53, %v4252_v52  ;;  %v1167_v40 = vrot.slane %v1041_v16, 2  ;;  %v1289_v36 = vmul.f32 %v4386_v10, %v4247_v44 }
 0x13d   : > { %v914_v45 = vadd.f32 %v849_v12, %v665_v13  ;;  %v915_v19 = vadd.f32 %v851_v38, %v666_v61  ;;  %v1290_v32 = vmul.f32 %v4386_v10, %v4250_v23  ;;  %v1291_v1 = vmul.f32 %v4386_v10, %v4252_v52  ;;  %v2172_v10 = vpop.f32.mrf.mxu0 }
 0x13e   : > { %v1168_v56 = vrot.slane %v1042_v50, 2  ;;  %v1170_v14 = vrot.slane %v1043_v49, 2  ;;  %v1415_v63 = vrot.slane %v1289_v36, 4  ;;  %v1522_v53 = vmul.f32 %v4398_v60, %v4441_v55 }
 0x13f   : > { %v986_v15 = vadd.f32 %v954_v2, %v914_v45  ;;  %v987_v54 = vadd.f32 %v955_v43, %v915_v19  ;;  %v1416_v44 = vrot.slane %v1290_v32, 4  ;;  %v1418_v34 = vrot.slane %v1291_v1, 4  ;;  %v2928_v22 = vpop.f32.mrf.mxu0 }
 0x140   : > { %v1169_v59 = vsel %vm522_vm1, %v1167_v40, %v1168_v56  ;;  %v1171_v4 = vsel %vm522_vm1, %v1168_v56, %v1170_v14  ;;  %v1523_v23 = vmul.f32 %v4398_v60, %v4444_v20  ;;  %v1609_v52 = vmul.f32 %v4410_v28, %v4441_v55 }
 0x141   : > { %v1234_v6 = vadd.f32 %v1169_v59, %v986_v15  ;;  %v1235_v11 = vadd.f32 %v1171_v4, %v987_v54  ;;  %v1417_v39 = vsel %vm771_vm2, %v1415_v63, %v1416_v44  ;;  %v1419_v0 = vsel %vm771_vm2, %v1416_v44, %v1418_v34  ;;  %v2175_v62 = vpop.f32.mrf.mxu0 }
 0x142   : > { %v1610_v46 = vmul.f32 %v4410_v28, %v4444_v20  ;;  %v1611_v60 = vmul.f32 %v4410_v28, %v346_v47  ;;  %v1735_v5 = vrot.slane %v1609_v52, 2  ;;  %v1857_v17 = vmul.f32 %v4425_v57, %v4441_v55 }
 0x143   : > { %v1482_v3 = vadd.f32 %v1417_v39, %v1234_v6  ;;  %v1483_v18 = vadd.f32 %v1419_v0, %v1235_v11  ;;  %v1858_v25 = vmul.f32 %v4425_v57, %v4444_v20  ;;  %v1859_v42 = vmul.f32 %v4425_v57, %v346_v47 }
 0x144   : > { %v1736_v51 = vrot.slane %v1610_v46, 2  ;;  %v1738_v27 = vrot.slane %v1611_v60, 2  ;;  %v1983_v7 = vrot.slane %v1857_v17, 4  ;;  %v2321_v20 = vmul.f32 %v4429_v48, %v4429_v48 }
 0x145   : > { %v1554_v37 = vadd.f32 %v1522_v53, %v1482_v3  ;;  %v1555_v28 = vadd.f32 %v1523_v23, %v1483_v18  ;;  %v1984_v8 = vrot.slane %v1858_v25, 4  ;;  %v1986_v30 = vrot.slane %v1859_v42, 4 }
 0x146   : > { %v1737_v55 = vsel %vm522_vm1, %v1735_v5, %v1736_v51  ;;  %v1739_v2 = vsel %vm522_vm1, %v1736_v51, %v1738_v27  ;;  %v2815_v33 = vpack.c.bf16 %v4449_v9, %v4402_v31  ;;  %v2283_v29 = vadd.f32 %v4469_v24, %v4429_v48 }
 0x147   : > { %v1802_v26 = vadd.f32 %v1737_v55, %v1554_v37  ;;  %v1803_v35 = vadd.f32 %v1739_v2, %v1555_v28  ;;  %v1985_v57 = vsel %vm771_vm2, %v1983_v7, %v1984_v8  ;;  %v1987_v47 = vsel %vm771_vm2, %v1984_v8, %v1986_v30 }
 0x148   : > { %v2322_v41 = vmul.f32 %v4469_v24, %v4469_v24  ;;  %v2810_v58 = vpack.c.bf16 %v4469_v24, %v4429_v48  ;;  %v2323_v13 = vmul.f32 %v4402_v31, %v4402_v31  ;;  %2887 = vst [vmem:[%s4534_s30 + $0x8] sm:$0xff] %v2815_v33   ;;  %v2284_v61 = vadd.f32 %v4402_v31, %v2283_v29 }
 0x149   : > { %v2050_v43 = vadd.f32 %v1985_v57, %v1802_v26  ;;  %v2051_v16 = vadd.f32 %v1987_v47, %v1803_v35  ;;  %v2825_v38 = vpack.c.bf16 %v2928_v22, %v4486_v21  ;;  %v2820_v24 = vpack.c.bf16 %v2175_v62, %v2172_v10 }
 0x14a   : > { %v2353_v12 = vadd.f32 %v2322_v41, %v2321_v20  ;;  %2811 = vst [vmem:[%s4534_s30] sm:$0xff] %v2810_v58   ;;  %v2324_v50 = vmul.f32 %v4449_v9, %v4449_v9  ;;  %v2285_v40 = vadd.f32 %v4449_v9, %v2284_v61  ;;  %v2325_v45 = vmul.f32 %v2172_v10, %v2172_v10 }
 0x14b   : > { %v2067_v48 = vpack.c.bf16 %v2051_v16, %v2050_v43  ;;  %2889 = vst [vmem:[%s4534_s30 + $0x18] sm:$0xff] %v2825_v38   ;;  %2888 = vst [vmem:[%s4534_s30 + $0x10] sm:$0xff] %v2820_v24   ;;  %v2326_v31 = vmul.f32 %v2175_v62, %v2175_v62  ;;  %v2327_v56 = vmul.f32 %v4486_v21, %v4486_v21 }
 0x14c   : > { %v2354_v49 = vadd.f32 %v2353_v12, %v2323_v13  ;;  %v2286_v36 = vadd.f32 %v2285_v40, %v2172_v10  ;;  %v2328_v53 = vmul.f32 %v2928_v22, %v2928_v22 }
 0x14d   : > { %2950 = vmatmul.mubr.msk.bf16.gmra.mxu1 %vm2069_vm3, %v2067_v48 }
 0x14e   : > { %v2355_v19 = vadd.f32 %v2354_v49, %v2324_v50  ;;  %v2287_v1 = vadd.f32 %v2286_v36, %v2175_v62 }
 0x150   : > { %v2356_v32 = vadd.f32 %v2355_v19, %v2325_v45  ;;  %v2288_v14 = vadd.f32 %v4486_v21, %v2287_v1 }
 0x152   : > { %v2357_v63 = vadd.f32 %v2356_v32, %v2326_v31  ;;  %v2289_v54 = vadd.f32 %v2928_v22, %v2288_v14 }
 0x154   : > { %v2358_v15 = vadd.f32 %v2357_v63, %v2327_v56  ;;  %v2931_v9 = vpop.f32.mrf.mxu0 }
 0x155   : > { %v2331_v46 = vmul.f32 %v2931_v9, %v2931_v9 }
 0x156   : > { %v2188_v44 = vpop.f32.mrf.mxu0  ;;  %v2359_v34 = vadd.f32 %v2358_v15, %v2328_v53 }
 0x157   : > { %v2290_v59 = vadd.f32 %v2289_v54, %v2188_v44  ;;  %v2329_v4 = vmul.f32 %v2188_v44, %v2188_v44 }
 0x158   : > { %v2932_v23 = vpop.f32.mrf.mxu0 }
 0x159   : > { %v2360_v52 = vadd.f32 %v2359_v34, %v2329_v4  ;;  %v2835_v10 = vpack.c.bf16 %v2932_v23, %v2931_v9  ;;  %v2332_v5 = vmul.f32 %v2932_v23, %v2932_v23 }
 0x15a   : > { %v2191_v6 = vpop.f32.mrf.mxu0 }
 0x15b   : > { %2891 = vst [vmem:[%s4534_s30 + $0x28] sm:$0xff] %v2835_v10   ;;  %v2291_v11 = vadd.f32 %v2290_v59, %v2191_v6  ;;  %v2330_v39 = vmul.f32 %v2191_v6, %v2191_v6  ;;  %v2830_v0 = vpack.c.bf16 %v2191_v6, %v2188_v44 }
 0x15d   : > { %v2292_v21 = vadd.f32 %v2931_v9, %v2291_v11  ;;  %v2361_v60 = vadd.f32 %v2360_v52, %v2330_v39  ;;  %2890 = vst [vmem:[%s4534_s30 + $0x20] sm:$0xff] %v2830_v0  }
 0x15f   : > { %v2362_v17 = vadd.f32 %v2361_v60, %v2331_v46  ;;  %v2293_v3 = vadd.f32 %v2932_v23, %v2292_v21 }
 0x161   : > { %v2363_v18 = vadd.f32 %v2362_v17, %v2332_v5 }
 0x179   : > { %v2935_v25 = vpop.f32.mrf.mxu0 }
 0x17a   : > { %v2335_v2 = vmul.f32 %v2935_v25, %v2935_v25 }
 0x17b   : > { %v2204_v42 = vpop.f32.mrf.mxu0 }
 0x17c   : > { %v2294_v51 = vadd.f32 %v2293_v3, %v2204_v42  ;;  %v2333_v27 = vmul.f32 %v2204_v42, %v2204_v42 }
 0x17d   : > { %v2936_v7 = vpop.f32.mrf.mxu0 }
 0x17e   : > { %v2364_v22 = vadd.f32 %v2363_v18, %v2333_v27  ;;  %v2845_v37 = vpack.c.bf16 %v2936_v7, %v2935_v25  ;;  %v2336_v35 = vmul.f32 %v2936_v7, %v2936_v7 }
 0x17f   : > { %v2207_v28 = vpop.f32.mrf.mxu0 }
 0x180   : > { %2893 = vst [vmem:[%s4534_s30 + $0x38] sm:$0xff] %v2845_v37   ;;  %v2295_v8 = vadd.f32 %v2294_v51, %v2207_v28  ;;  %v2334_v30 = vmul.f32 %v2207_v28, %v2207_v28  ;;  %v2840_v55 = vpack.c.bf16 %v2207_v28, %v2204_v42 }
 0x182   : > { %v2296_v20 = vadd.f32 %v2935_v25, %v2295_v8  ;;  %v2365_v26 = vadd.f32 %v2364_v22, %v2334_v30  ;;  %2892 = vst [vmem:[%s4534_s30 + $0x30] sm:$0xff] %v2840_v55  }
 0x184   : > { %v2297_v57 = vadd.f32 %v2936_v7, %v2296_v20  ;;  %v2366_v47 = vadd.f32 %v2365_v26, %v2335_v2 }
 0x186   : > { %v2367_v33 = vadd.f32 %v2366_v47, %v2336_v35 }
 0x19e   : > { %v2939_v29 = vpop.f32.mrf.mxu1 }
 0x19f   : > { %v2339_v24 = vmul.f32 %v2939_v29, %v2939_v29 }
 0x1a0   : > { %v2220_v41 = vpop.f32.mrf.mxu1 }
 0x1a1   : > { %v2337_v58 = vmul.f32 %v2220_v41, %v2220_v41  ;;  %v2298_v62 = vadd.f32 %v2297_v57, %v2220_v41 }
 0x1a2   : > { %v2940_v43 = vpop.f32.mrf.mxu1 }
 0x1a3   : > { %v2855_v16 = vpack.c.bf16 %v2940_v43, %v2939_v29  ;;  %v2368_v13 = vadd.f32 %v2367_v33, %v2337_v58  ;;  %v2340_v40 = vmul.f32 %v2940_v43, %v2940_v43 }
 0x1a4   : > { %v2223_v61 = vpop.f32.mrf.mxu1 }
 0x1a5   : > { %2895 = vst [vmem:[%s4534_s30 + $0x48] sm:$0xff] %v2855_v16   ;;  %v2299_v12 = vadd.f32 %v2298_v62, %v2223_v61  ;;  %v2338_v38 = vmul.f32 %v2223_v61, %v2223_v61  ;;  %v2850_v48 = vpack.c.bf16 %v2223_v61, %v2220_v41 }
 0x1a7   : > { %v2300_v50 = vadd.f32 %v2939_v29, %v2299_v12  ;;  %v2369_v49 = vadd.f32 %v2368_v13, %v2338_v38  ;;  %2894 = vst [vmem:[%s4534_s30 + $0x40] sm:$0xff] %v2850_v48  }
 0x1a9   : > { %v2370_v36 = vadd.f32 %v2369_v49, %v2339_v24  ;;  %v2301_v45 = vadd.f32 %v2940_v43, %v2300_v50 }
 0x1ab   : > { %v2371_v19 = vadd.f32 %v2370_v36, %v2340_v40 }
 0x1c3   : > { %v2943_v31 = vpop.f32.mrf.mxu1 }
 0x1c4   : > { %v2343_v34 = vmul.f32 %v2943_v31, %v2943_v31 }
 0x1c5   : > { %v2236_v32 = vpop.f32.mrf.mxu1 }
 0x1c6   : > { %v2302_v1 = vadd.f32 %v2301_v45, %v2236_v32  ;;  %v2341_v56 = vmul.f32 %v2236_v32, %v2236_v32 }
 0x1c7   : > { %v2944_v14 = vpop.f32.mrf.mxu1 }
 0x1c8   : > { %v2372_v63 = vadd.f32 %v2371_v19, %v2341_v56  ;;  %v2865_v53 = vpack.c.bf16 %v2944_v14, %v2943_v31  ;;  %v2344_v23 = vmul.f32 %v2944_v14, %v2944_v14 }
 0x1c9   : > { %v2239_v15 = vpop.f32.mrf.mxu1 }
 0x1ca   : > { %2897 = vst [vmem:[%s4534_s30 + $0x58] sm:$0xff] %v2865_v53   ;;  %v2303_v9 = vadd.f32 %v2302_v1, %v2239_v15  ;;  %v2342_v54 = vmul.f32 %v2239_v15, %v2239_v15  ;;  %v2860_v44 = vpack.c.bf16 %v2239_v15, %v2236_v32 }
 0x1cc   : > { %v2304_v59 = vadd.f32 %v2943_v31, %v2303_v9  ;;  %v2373_v4 = vadd.f32 %v2372_v63, %v2342_v54  ;;  %2896 = vst [vmem:[%s4534_s30 + $0x50] sm:$0xff] %v2860_v44  }
 0x1ce   : > { %v2374_v52 = vadd.f32 %v2373_v4, %v2343_v34  ;;  %v2305_v10 = vadd.f32 %v2944_v14, %v2304_v59 }
 0x1d0   : > { %v2375_v6 = vadd.f32 %v2374_v52, %v2344_v23 }
 0x1e8   : > { %v2947_v11 = vpop.f32.mrf.mxu1 }
 0x1e9   : > { %v2347_v51 = vmul.f32 %v2947_v11, %v2947_v11 }
 0x1ea   : > { %v2252_v39 = vpop.f32.mrf.mxu1 }
 0x1eb   : > { %v2306_v5 = vadd.f32 %v2305_v10, %v2252_v39  ;;  %v2345_v17 = vmul.f32 %v2252_v39, %v2252_v39 }
 0x1ec   : > { %v2948_v0 = vpop.f32.mrf.mxu1 }
 0x1ed   : > { %v2875_v46 = vpack.c.bf16 %v2948_v0, %v2947_v11  ;;  %v2376_v3 = vadd.f32 %v2375_v6, %v2345_v17  ;;  %v2348_v22 = vmul.f32 %v2948_v0, %v2948_v0 }
 0x1ee   : > { %v2255_v21 = vpop.f32.mrf.mxu1 }
 0x1ef   : > { %2899 = vst [vmem:[%s4534_s30 + $0x68] sm:$0xff] %v2875_v46   ;;  %v2870_v60 = vpack.c.bf16 %v2255_v21, %v2252_v39  ;;  %v2307_v18 = vadd.f32 %v2306_v5, %v2255_v21  ;;  %v2346_v25 = vmul.f32 %v2255_v21, %v2255_v21 }
 0x1f1   : > { %2898 = vst [vmem:[%s4534_s30 + $0x60] sm:$0xff] %v2870_v60   ;;  %v2377_v42 = vadd.f32 %v2376_v3, %v2346_v25  ;;  %v2308_v27 = vadd.f32 %v2947_v11, %v2307_v18 }
 0x1f3   : > { %v2378_v7 = vadd.f32 %v2377_v42, %v2347_v51  ;;  %v2309_v37 = vadd.f32 %v2948_v0, %v2308_v27 }
 0x1f5   : > { %v2379_v8 = vadd.f32 %v2378_v7, %v2348_v22 }
 0x20d   : > { %v2951_v28 = vpop.f32.mrf.mxu1 }
 0x20e   : > { %v2351_v41 = vmul.f32 %v2951_v28, %v2951_v28 }
 0x20f   : > { %v2268_v30 = vpop.f32.mrf.mxu1 }
 0x210   : > { %v2310_v55 = vadd.f32 %v2309_v37, %v2268_v30  ;;  %v2349_v2 = vmul.f32 %v2268_v30, %v2268_v30 }
 0x211   : > { %v2952_v20 = vpop.f32.mrf.mxu1 }
 0x212   : > { %v2380_v26 = vadd.f32 %v2379_v8, %v2349_v2  ;;  %v2885_v35 = vpack.c.bf16 %v2952_v20, %v2951_v28 }
 0x213   : > { %v2271_v57 = vpop.f32.mrf.mxu1 }
 0x214   : > { %2901 = vst [vmem:[%s4534_s30 + $0x78] sm:$0xff] %v2885_v35   ;;  %v2311_v47 = vadd.f32 %v2310_v55, %v2271_v57  ;;  %v2350_v33 = vmul.f32 %v2271_v57, %v2271_v57  ;;  %v2880_v29 = vpack.c.bf16 %v2271_v57, %v2268_v30 }
 0x216   : > { %v2312_v58 = vadd.f32 %v2951_v28, %v2311_v47  ;;  %v2381_v62 = vadd.f32 %v2380_v26, %v2350_v33  ;;  %2900 = vst [vmem:[%s4534_s30 + $0x70] sm:$0xff] %v2880_v29  }
 0x217   : > { %3051 = shalt.err (!%p3048_p5)
}
 0x218   : > { %s3052_s22 = scalar_lea.hbm %s4564_s10, 2048  ;;  %s3056_s29 = scalar_lea.hbm %s4636_s3, 4096 }
 0x219   : > { %p3053_p6 = scmp.ne.s32.totalorder %s4564_s10, %s3052_s22  ;;  %p3057_p10 = scmp.lt.s32.totalorder %s4564_s10, %s4636_s3 }
 0x21a   : > { %p3058_p11 = scmp.lt.s32.totalorder %s3056_s29, %s3052_s22 }
 0x21b   : > { %p3054_p7 = pnand %p3053_p6, %p3215_p4 }
 0x21c   : > { %p3059_p12 = por %p3058_p11, %p3057_p10 }
 0x21d   : > { %p3055_p9 = pneg %p3054_p7 }
 0x21f   : > { %p3060_p13 = pnand %p3059_p12, %p3055_p9 }
 0x221   : > { %3063 = shalt.err (!%p3060_p13)
}
 0x222   : > { %s3147_s7 = smov 64   ;;  %s3148_s8 = smov 4   ;;  %v2352_v43 = vmul.f32 %v2952_v20, %v2952_v20  ;;  %v2313_v16 = vadd.f32 %v2952_v20, %v2312_v58  ;;  %v2382_v13 = vadd.f32 %v2381_v62, %v2351_v41 }
 0x223   : > { %2958 = dma.vmem_to_hbm [thread:$0]  (%p3215_p4), %s4566_s6, 2048, %s4564_s10, %s2552_s11, %s3147_s7, %s3147_s7, %s3148_s8  }
 0x224   : > { %v2314_v61 = vrot.slane %v2313_v16, 4  ;;  %v2383_v12 = vadd.f32 %v2382_v13, %v2352_v43  ;;  %s2700_s12 = sshll.u32 %s4503_s9, 1  ;;  %s2771_s13 = sshll.u32 %s3136_s18, 5 }
 0x225   : > { %s217_s14 = scalar_lea.vmem [#allocation4], %s2700_s12  ;;  %s2587_s11 = scalar_lea.hbm %s4637_s4, %s2771_s13 }
 0x226   : > { %v2315_v38 = vadd.f32 %v2314_v61, %v2313_v16  ;;  %v2384_v48 = vrot.slane %v2383_v12, 4  ;;  %s2589_s21 = sshll.u32 %s217_s14, 4  ;;  %s2557_s22 = scalar_lea.sflag [#allocation5], %s4503_s9  ;;  %s2590_s21 = int_to_ptr.vmem [resolvable:$true] %s2589_s21 }
 0x227   : > { %s3064_s24 = scalar_lea.vmem %s2590_s21, 32  ;;  %s3149_s26 = smov [#allocation4]  }
 0x228   : > { %v2316_v24 = vrot.slane %v2315_v38, 2  ;;  %v2385_v50 = vadd.f32 %v2384_v48, %v2383_v12  ;;  %p3065_p0 = scmp.ne.s32.totalorder %s2590_s21, %s3064_s24  ;;  %s3068_s18 = sshll.u32 %s3149_s26, 4  ;;  %s3069_s18 = int_to_ptr.vmem [resolvable:$false] %s3068_s18 }
 0x229   : > { %s3070_s29 = scalar_lea.vmem %s3069_s18, 64  ;;  %p3071_p3 = scmp.lt.s32.totalorder %s2590_s21, %s3069_s18 }
 0x22a   : > { %v2317_v49 = vadd.f32 %v2316_v24, %v2315_v38  ;;  %v2386_v40 = vrot.slane %v2385_v50, 2  ;;  %p3066_p1 = pnand %p3065_p0, %p3215_p4  ;;  %p3072_p5 = scmp.lt.s32.totalorder %s3070_s29, %s3064_s24 }
 0x22c   : > { %v2318_v36 = vrot.slane %v2317_v49, 1  ;;  %v2387_v45 = vadd.f32 %v2386_v40, %v2385_v50  ;;  %p3067_p2 = pneg %p3066_p1  ;;  %p3073_p6 = por %p3072_p5, %p3071_p3 }
 0x22e   : > { %v2319_v19 = vadd.f32 %v2318_v36, %v2317_v49  ;;  %v2388_v31 = vrot.slane %v2387_v45, 1  ;;  %p3074_p7 = pnand %p3073_p6, %p3067_p2 }
 0x230   : > { %2320 = vst [vmem:[%s217_s14] sm:$0x1] %v2319_v19  ;;  %v2389_v32 = vadd.f32 %v2388_v31, %v2387_v45 }
 0x232   : > { %2390 = vst [vmem:[%s217_s14 + $0x1] sm:$0x1] %v2389_v32 }
 0x233   : > { %3077 = shalt.err (!%p3074_p7)
}
 0x234   : > { %s3078_s30 = scalar_lea.hbm %s2587_s11, 32  ;;  %s3082_s7 = scalar_lea.hbm %s4637_s4, 64 }
 0x235   : > { %p3079_p9 = scmp.ne.s32.totalorder %s2587_s11, %s3078_s30  ;;  %p3083_p12 = scmp.lt.s32.totalorder %s2587_s11, %s4637_s4 }
 0x236   : > { %p3084_p13 = scmp.lt.s32.totalorder %s3082_s7, %s3078_s30 }
 0x237   : > { %p3080_p10 = pnand %p3079_p9, %p3215_p4 }
 0x238   : > { %p3085_p0 = por %p3084_p13, %p3083_p12 }
 0x239   : > { %p3081_p11 = pneg %p3080_p10 }
 0x23b   : > { %p3086_p1 = pnand %p3085_p0, %p3081_p11 }
 0x23d   : > { %3089 = shalt.err (!%p3086_p1)
}
 0x23e   : > { %2959 = dma.vmem_to_hbm [thread:$0]  (%p3215_p4), %s2590_s21, 32, %s2587_s11, %s2557_s22  }
 0x23f PF: > { %p2969_p2 = scmp.ge.s32.totalorder %s3144_s20, 2  ;;  %s2601_s13 = sand.u32 1, %s3124_s15  }
 0x240   : > { %s2602_s14 = scalar_lea.sflag [#allocation3], %s2601_s13 }
 0x241   : > { %p2963_p3 = pnand %p2969_p2, %p3222_p8 }
 0x243   : > { %p2964_p5 = pneg %p2963_p3 }
 0x245   : > { %3115 = dma.done.wait (%p2964_p5), %s2602_s14, 2048  }
 0x246   : > { %3117 = vsyncadd (%p2964_p5), %s2602_s14, 4294965248  ;;  %s2611_s6 = scalar_lea.sflag [#allocation5], %s2601_s13 }
 0x247   : > { %3119 = dma.done.wait (%p2964_p5), %s2611_s6, 32  }
 0x248   : > { %3121 = vsyncadd (%p2964_p5), %s2611_s6, 4294967264  ;;  %s21_s20 = sadd.s32 1, %s3144_s20   ;;  %s4640_s15 = smov %s3128_s16 }
 0x249   : > { %p18_p6 = scmp.ge.s32.totalorder %s21_s20, 4   ;;  %s4641_s16 = smov %s3132_s17 }
 0x24a   : > { %s4642_s17 = smov %s3228_s28  ;;  %s4643_s18 = smov %s3140_s19 }
 0x24b   : > { %s4644_s19 = smov %s4646_s23  ;;  %20 = sbr.rel (!%p18_p6) target bundleno = 6 (0x6), region = 93 }
 0x250   :  { %2616 = vsyncpa [#allocation3], 1 }
 0x251   :  { %2618 = vsyncpa [#allocation3 + $0x1], 1 }
 0x252   :  { %2619 = vsyncpa [#allocation5], 1 }
 0x253   :  { %2621 = vsyncpa [#allocation5 + $0x1], 1 }

</bundles_post_ra>
